<compile_context>
chip_gen: v5e
topology: v5e:2x2
jax: 0.10.0
libtpu: 0.0.40
codegen_flags: <defaults>
</compile_context>

<pallas_src>
import numpy as np
import jax
import jax.numpy as jnp
from jax import lax
from jax.experimental import pallas as pl
from jax.experimental.pallas import tpu as pltpu

H = W = 16            # input spatial size
HW = H * W
CIN = 4               # input channels
CMID = 32             # conv output channels
DOUT = 64             # FID feature dimension (2048 in real InceptionV3)
KH = KW = 3           # conv kernel size

HP = H + 2            # 'same'-padded rows per image
WP = W + 2            # 'same'-padded cols per image
LANE = 128            # lane width; WP*CIN = 72 zero-padded to 128
WCOL = W * CMID       # 512: conv output lanes per row, (w, co) pairs
DPAD = 128            # DOUT padded to a full lane tile

CHUNK_IMGS = 8                  # images per inner-loop chunk
CHUNK_ROWS = CHUNK_IMGS * HP    # 144 padded rows per chunk


def _round_up(a, m):
    return -(-a // m) * m


def _make_feature_kernel(nchunks):
    """Kernel over one batch tile; processes CHUNK_IMGS images per inner step."""

    def kernel(x0_ref, x1_ref, x2_ref, taps_ref, bct_ref, sel_ref, wpt_ref,
               bpp_ref, out_ref):
        # x0/x1/x2 : (tb*HP, 128) bf16   padded image rows, shifted by 0/1/2
        # taps     : (3, 128, 512) bf16  banded per-kh conv tap matrices
        # bct      : (1, 512)  f32       conv bias tiled over w
        # sel      : (8, 144)  f32       0/1 h-pool selection (valid rows only)
        # wpt      : (512, 128) f32      projection weight * 1/(H*W), tiled over w
        # bpp      : (1, 128)  f32       projection bias (lane padded)
        # out      : (tb, 128) f32       per-image features

        def chunk(c, carry):
            base = pl.multiple_of(c * CHUNK_ROWS, 16)
            a0 = x0_ref[pl.ds(base, CHUNK_ROWS), :]    # rows r,   bf16 (144,128)
            a1 = x1_ref[pl.ds(base, CHUNK_ROWS), :]    # rows r+1
            a2 = x2_ref[pl.ds(base, CHUNK_ROWS), :]    # rows r+2
            # 3x3 'same' conv as three accumulating banded row-tap matmuls
            # (bf16 in, f32 accumulate): q[i*HP+h, w*CMID+co] = conv - bias.
            q = jnp.dot(a0, taps_ref[0], preferred_element_type=jnp.float32)
            q = q + jnp.dot(a1, taps_ref[1], preferred_element_type=jnp.float32)
            q = q + jnp.dot(a2, taps_ref[2], preferred_element_type=jnp.float32)
            qr = jnp.maximum(q + bct_ref[...], 0.0)     # bias + ReLU, f32 (144,512)
            # Pool over h: 0/1 selection matmul keeps the 16 valid conv rows of
            # each 18-row image block; pool over w (and the 1/(H*W) GAP scale)
            # is folded into wpt.  Both projection operands stay f32.
            pooled = jnp.dot(sel_ref[...], qr,
                             preferred_element_type=jnp.float32)          # (8, 512)
            feat = jnp.dot(pooled, wpt_ref[...],
                           preferred_element_type=jnp.float32) + bpp_ref[...]
            out_ref[pl.ds(pl.multiple_of(c * CHUNK_IMGS, CHUNK_IMGS),
                          CHUNK_IMGS), :] = feat
            return carry

        lax.fori_loop(0, nchunks, chunk, 0, unroll=True)

    return kernel


def make_fid_incv3(params):
    """Builds the synthetic FID extractor.  One-time weight preprocessing here
    mirrors nn.Module construction; the returned callable is the hot path."""
    wc, bc, wp, bp = params                      # (3,3,CIN,CMID), (1,CMID), (CMID,DOUT), (1,DOUT)
    wc_np = np.asarray(wc, np.float32)

    # Banded per-kh tap matrices:
    #   taps[kh, (w+kw)*CIN + ci, w*CMID + co] = wc[kh, kw, ci, co]
    taps_np = np.zeros((KH, LANE, WCOL), np.float32)
    for kh in range(KH):
        for kw in range(KW):
            for w in range(W):
                r0 = (w + kw) * CIN
                c0 = w * CMID
                taps_np[kh, r0:r0 + CIN, c0:c0 + CMID] = wc_np[kh, kw]
    taps = jnp.asarray(taps_np, jnp.bfloat16)

    # Conv bias tiled over w -> (1, WCOL), f32.
    bct = jnp.tile(bc.astype(jnp.float32).reshape(1, CMID), (1, W))

    # 0/1 selection summing the 16 valid conv rows of each image in a chunk.
    sel_np = np.zeros((CHUNK_IMGS, CHUNK_ROWS), np.float32)
    for i in range(CHUNK_IMGS):
        sel_np[i, i * HP: i * HP + H] = 1.0
    sel = jnp.asarray(sel_np)

    # Projection weight tiled over w with the 1/(H*W) GAP scale folded in
    # (exact: HW = 2^8); kept f32, output lanes padded 64 -> 128.
    wpt = jnp.tile(wp.astype(jnp.float32) * (1.0 / HW), (W, 1))   # (WCOL, DOUT)
    wpt = jnp.pad(wpt, ((0, 0), (0, DPAD - DOUT)))
    bpp = jnp.pad(bp.astype(jnp.float32), ((0, 0), (0, DPAD - DOUT)))  # (1, DPAD)

    def fid_incv3(x_nchw):
        n = x_nchw.shape[0]
        # Batch tile: up to 64 images per grid step; >= 2 grid steps whenever
        # N allows so both v7x TensorCores get a batch tile.
        if n <= CHUNK_IMGS:
            tb = CHUNK_IMGS
        else:
            tb = min(64, _round_up(pl.cdiv(n, 2), CHUNK_IMGS))
        n_pad = _round_up(n, tb)
        grid_n = n_pad // tb
        nchunks = tb // CHUNK_IMGS

        # --- bf16 glue: NCHW -> 'same'-padded NHWC rows (n_pad*HP, 128) ----
        x = jnp.transpose(x_nchw, (0, 2, 3, 1)).astype(jnp.bfloat16)   # (N,H,W,CIN)
        xp = jnp.pad(x, ((0, n_pad - n), (1, 1), (1, 1), (0, 0)))      # (n_pad,HP,WP,CIN)
        rows = xp.reshape(n_pad, HP, WP * CIN)
        rows = jnp.pad(rows, ((0, 0), (0, 0), (0, LANE - WP * CIN)))
        rows = rows.reshape(n_pad * HP, LANE)
        # Three kh-shifted row views (shift baked in here so all in-kernel
        # slices are sublane-aligned).
        L = n_pad * HP
        ext = jnp.pad(rows, ((0, 8), (0, 0)))
        x0 = ext[0:L]
        x1 = ext[1:L + 1]
        x2 = ext[2:L + 2]

        feats_pad = pl.pallas_call(
            _make_feature_kernel(nchunks),
            out_shape=jax.ShapeDtypeStruct((n_pad, DPAD), jnp.float32),
            grid=(grid_n,),
            in_specs=[
                pl.BlockSpec((tb * HP, LANE), lambda b: (b, 0)),
                pl.BlockSpec((tb * HP, LANE), lambda b: (b, 0)),
                pl.BlockSpec((tb * HP, LANE), lambda b: (b, 0)),
                pl.BlockSpec((KH, LANE, WCOL), lambda b: (0, 0, 0)),
                pl.BlockSpec((1, WCOL), lambda b: (0, 0)),
                pl.BlockSpec((CHUNK_IMGS, CHUNK_ROWS), lambda b: (0, 0)),
                pl.BlockSpec((WCOL, DPAD), lambda b: (0, 0)),
                pl.BlockSpec((1, DPAD), lambda b: (0, 0)),
            ],
            out_specs=pl.BlockSpec((tb, DPAD), lambda b: (b, 0)),
            compiler_params=pltpu.CompilerParams(
                dimension_semantics=("parallel",)),
        )(x0, x1, x2, taps, bct, sel, wpt, bpp)

        feats = feats_pad[:n, :DOUT]              # drop batch / lane padding
        # Feature block shaped (N, C, 1, 1), as the PyTorch FID network returns.
        return [feats[:, :, None, None]]

    return jax.jit(fid_incv3)


def wrapper_inception_v3_forward(x, fid_incv3):
    """Exact semantics of WrapperInceptionV3.forward."""
    y = fid_incv3(x)
    y = y[0]                # first feature block, (N, DOUT, 1, 1)
    y = y[:, :, 0, 0]       # squeeze trailing 1x1 spatial -> (N, DOUT)
    return y


if __name__ == "__main__":
    key = jax.random.PRNGKey(0)
    kx, kwc, kbc, kwp, kbp = jax.random.split(key, 5)

    # Deterministic synthetic parameters (shapes implied by the forward pass).
    wc = 0.1 * jax.random.normal(kwc, (KH, KW, CIN, CMID), jnp.float32)
    bc = 0.1 * jax.random.normal(kbc, (1, CMID), jnp.float32)
    wp = 0.1 * jax.random.normal(kwp, (CMID, DOUT), jnp.float32)
    bp = 0.1 * jax.random.normal(kbp, (1, DOUT), jnp.float32)
    net = make_fid_incv3((wc, bc, wp, bp))

    # PyTorch-style NCHW input.
    x = jax.random.normal(kx, (2, CIN, H, W), jnp.float32)

    y = wrapper_inception_v3_forward(x, net)
    y = jax.block_until_ready(y)
    assert y.shape == (2, DOUT), y.shape
    assert y.dtype == jnp.float32

    print("KERNEL_OK")
</pallas_src>

<mosaic_0001>
module attributes {stable_mosaic.version = 11 : i64} {
  func.func @kernel(%arg0: i32, %arg1: memref<144x128xbf16, #tpu.memory_space<vmem>>, %arg2: memref<144x128xbf16, #tpu.memory_space<vmem>>, %arg3: memref<144x128xbf16, #tpu.memory_space<vmem>>, %arg4: memref<3x128x512xbf16, #tpu.memory_space<vmem>>, %arg5: memref<1x512xf32, #tpu.memory_space<vmem>>, %arg6: memref<8x144xf32, #tpu.memory_space<vmem>>, %arg7: memref<512x128xf32, #tpu.memory_space<vmem>>, %arg8: memref<1x128xf32, #tpu.memory_space<vmem>>, %arg9: memref<8x128xf32, #tpu.memory_space<vmem>>) attributes {dimension_semantics = [#tpu.dimension_semantics<parallel>], iteration_bounds = array<i64: 1>, scalar_prefetch = 0 : i64, scratch_operands = 0 : i64, tpu.core_type = #tpu.core_type<tc>, window_params = [{transform_indices = @transform_0, window_bounds = array<i64: 144, 128>}, {transform_indices = @transform_1, window_bounds = array<i64: 144, 128>}, {transform_indices = @transform_2, window_bounds = array<i64: 144, 128>}, {pipeline_mode = #tpu.pipeline_mode<synchronous>, transform_indices = @transform_3, window_bounds = array<i64: 3, 128, 512>}, {pipeline_mode = #tpu.pipeline_mode<synchronous>, transform_indices = @transform_4, window_bounds = array<i64: 1, 512>}, {pipeline_mode = #tpu.pipeline_mode<synchronous>, transform_indices = @transform_5, window_bounds = array<i64: 8, 144>}, {pipeline_mode = #tpu.pipeline_mode<synchronous>, transform_indices = @transform_6, window_bounds = array<i64: 512, 128>}, {pipeline_mode = #tpu.pipeline_mode<synchronous>, transform_indices = @transform_7, window_bounds = array<i64: 1, 128>}, {transform_indices = @transform_8, window_bounds = array<i64: 8, 128>}]} {
    %c0_i32 = arith.constant 0 : i32
    %c144_i32 = arith.constant 144 : i32
    %0 = arith.muli %c0_i32, %c144_i32 : i32
    %1 = tpu.assume_multiple %0, 16 : i32
    %2 = arith.index_cast %1 : i32 to index
    %c0 = arith.constant 0 : index
    %3 = vector.load %arg1[%2, %c0] : memref<144x128xbf16, #tpu.memory_space<vmem>>, vector<144x128xbf16>
    %4 = arith.index_cast %1 : i32 to index
    %c0_0 = arith.constant 0 : index
    %5 = vector.load %arg2[%4, %c0_0] : memref<144x128xbf16, #tpu.memory_space<vmem>>, vector<144x128xbf16>
    %6 = arith.index_cast %1 : i32 to index
    %c0_1 = arith.constant 0 : index
    %7 = vector.load %arg3[%6, %c0_1] : memref<144x128xbf16, #tpu.memory_space<vmem>>, vector<144x128xbf16>
    %c0_2 = arith.constant 0 : index
    %c0_3 = arith.constant 0 : index
    %c0_4 = arith.constant 0 : index
    %8 = vector.load %arg4[%c0_2, %c0_3, %c0_4] : memref<3x128x512xbf16, #tpu.memory_space<vmem>>, vector<1x128x512xbf16>
    %9 = vector.shape_cast %8 : vector<1x128x512xbf16> to vector<128x512xbf16>
    %cst = arith.constant dense<0.000000e+00> : vector<144x512xf32>
    %10 = tpu.matmul %3, %9, %cst {dimension_numbers = #tpu.dot_dimension_numbers<[1], [0], [0], [1], [0, 0, 1, 1], [], []>} : vector<144x128xbf16>, vector<128x512xbf16>, vector<144x512xf32> -> vector<144x512xf32>
    %c1 = arith.constant 1 : index
    %c0_5 = arith.constant 0 : index
    %c0_6 = arith.constant 0 : index
    %11 = vector.load %arg4[%c1, %c0_5, %c0_6] : memref<3x128x512xbf16, #tpu.memory_space<vmem>>, vector<1x128x512xbf16>
    %12 = vector.shape_cast %11 : vector<1x128x512xbf16> to vector<128x512xbf16>
    %cst_7 = arith.constant dense<0.000000e+00> : vector<144x512xf32>
    %13 = tpu.matmul %5, %12, %cst_7 {dimension_numbers = #tpu.dot_dimension_numbers<[1], [0], [0], [1], [0, 0, 1, 1], [], []>} : vector<144x128xbf16>, vector<128x512xbf16>, vector<144x512xf32> -> vector<144x512xf32>
    %14 = arith.addf %10, %13 : vector<144x512xf32>
    %c2 = arith.constant 2 : index
    %c0_8 = arith.constant 0 : index
    %c0_9 = arith.constant 0 : index
    %15 = vector.load %arg4[%c2, %c0_8, %c0_9] : memref<3x128x512xbf16, #tpu.memory_space<vmem>>, vector<1x128x512xbf16>
    %16 = vector.shape_cast %15 : vector<1x128x512xbf16> to vector<128x512xbf16>
    %cst_10 = arith.constant dense<0.000000e+00> : vector<144x512xf32>
    %17 = tpu.matmul %7, %16, %cst_10 {dimension_numbers = #tpu.dot_dimension_numbers<[1], [0], [0], [1], [0, 0, 1, 1], [], []>} : vector<144x128xbf16>, vector<128x512xbf16>, vector<144x512xf32> -> vector<144x512xf32>
    %18 = arith.addf %14, %17 : vector<144x512xf32>
    %c0_11 = arith.constant 0 : index
    %c0_12 = arith.constant 0 : index
    %19 = vector.load %arg5[%c0_11, %c0_12] : memref<1x512xf32, #tpu.memory_space<vmem>>, vector<1x512xf32>
    %20 = vector.broadcast %19 : vector<1x512xf32> to vector<144x512xf32>
    %21 = arith.addf %18, %20 : vector<144x512xf32>
    %cst_13 = arith.constant 0.000000e+00 : f32
    %22 = vector.broadcast %cst_13 : f32 to vector<144x512xf32>
    %23 = arith.maximumf %21, %22 : vector<144x512xf32>
    %c0_14 = arith.constant 0 : index
    %c0_15 = arith.constant 0 : index
    %24 = vector.load %arg6[%c0_14, %c0_15] : memref<8x144xf32, #tpu.memory_space<vmem>>, vector<8x144xf32>
    %cst_16 = arith.constant dense<0.000000e+00> : vector<8x512xf32>
    %25 = tpu.matmul %24, %23, %cst_16 {dimension_numbers = #tpu.dot_dimension_numbers<[1], [0], [0], [1], [0, 0, 1, 1], [], []>} : vector<8x144xf32>, vector<144x512xf32>, vector<8x512xf32> -> vector<8x512xf32>
    %c0_17 = arith.constant 0 : index
    %c0_18 = arith.constant 0 : index
    %26 = vector.load %arg7[%c0_17, %c0_18] : memref<512x128xf32, #tpu.memory_space<vmem>>, vector<512x128xf32>
    %cst_19 = arith.constant dense<0.000000e+00> : vector<8x128xf32>
    %27 = tpu.matmul %25, %26, %cst_19 {dimension_numbers = #tpu.dot_dimension_numbers<[1], [0], [0], [1], [0, 0, 1, 1], [], []>} : vector<8x512xf32>, vector<512x128xf32>, vector<8x128xf32> -> vector<8x128xf32>
    %c0_20 = arith.constant 0 : index
    %c0_21 = arith.constant 0 : index
    %28 = vector.load %arg8[%c0_20, %c0_21] : memref<1x128xf32, #tpu.memory_space<vmem>>, vector<1x128xf32>
    %29 = vector.broadcast %28 : vector<1x128xf32> to vector<8x128xf32>
    %30 = arith.addf %27, %29 : vector<8x128xf32>
    %c8_i32 = arith.constant 8 : i32
    %31 = arith.muli %c0_i32, %c8_i32 : i32
    %32 = tpu.assume_multiple %31, 8 : i32
    %33 = arith.index_cast %32 : i32 to index
    %c0_22 = arith.constant 0 : index
    %34 = vector.load %arg9[%33, %c0_22] : memref<8x128xf32, #tpu.memory_space<vmem>>, vector<8x128xf32>
    tpu.vector_store %arg9[%33, %c0_22], %30 {strides = array<i32>} : memref<8x128xf32, #tpu.memory_space<vmem>>, vector<8x128xf32>,
    %c1_i32 = arith.constant 1 : i32
    return
  }
  func.func @transform_0(%arg0: i32) -> (i32, i32) {
    %c0_i32 = arith.constant 0 : i32
    %c0_i32_0 = arith.constant 0 : i32
    return %arg0, %c0_i32 : i32, i32
  }
  func.func @transform_1(%arg0: i32) -> (i32, i32) {
    %c0_i32 = arith.constant 0 : i32
    %c0_i32_0 = arith.constant 0 : i32
    return %arg0, %c0_i32 : i32, i32
  }
  func.func @transform_2(%arg0: i32) -> (i32, i32) {
    %c0_i32 = arith.constant 0 : i32
    %c0_i32_0 = arith.constant 0 : i32
    return %arg0, %c0_i32 : i32, i32
  }
  func.func @transform_3(%arg0: i32) -> (i32, i32, i32) {
    %c0_i32 = arith.constant 0 : i32
    %c0_i32_0 = arith.constant 0 : i32
    %c0_i32_1 = arith.constant 0 : i32
    %c0_i32_2 = arith.constant 0 : i32
    return %c0_i32, %c0_i32_0, %c0_i32_1 : i32, i32, i32
  }
  func.func @transform_4(%arg0: i32) -> (i32, i32) {
    %c0_i32 = arith.constant 0 : i32
    %c0_i32_0 = arith.constant 0 : i32
    %c0_i32_1 = arith.constant 0 : i32
    return %c0_i32, %c0_i32_0 : i32, i32
  }
  func.func @transform_5(%arg0: i32) -> (i32, i32) {
    %c0_i32 = arith.constant 0 : i32
    %c0_i32_0 = arith.constant 0 : i32
    %c0_i32_1 = arith.constant 0 : i32
    return %c0_i32, %c0_i32_0 : i32, i32
  }
  func.func @transform_6(%arg0: i32) -> (i32, i32) {
    %c0_i32 = arith.constant 0 : i32
    %c0_i32_0 = arith.constant 0 : i32
    %c0_i32_1 = arith.constant 0 : i32
    return %c0_i32, %c0_i32_0 : i32, i32
  }
  func.func @transform_7(%arg0: i32) -> (i32, i32) {
    %c0_i32 = arith.constant 0 : i32
    %c0_i32_0 = arith.constant 0 : i32
    %c0_i32_1 = arith.constant 0 : i32
    return %c0_i32, %c0_i32_0 : i32, i32
  }
  func.func @transform_8(%arg0: i32) -> (i32, i32) {
    %c0_i32 = arith.constant 0 : i32
    %c0_i32_0 = arith.constant 0 : i32
    return %arg0, %c0_i32 : i32, i32
  }
}

</mosaic_0001>

<bundles_post_ra>
// kernel: fid_incv3.1
= control target key start
LH: loop header
LB: loop body
LE: loop exit
PB: predicated region body
PF: predicated region fallthrough
CT: control target
= control target key end

     0   :  { %vm1699_vm0 = vcmask 130048   ;;  %s4362_s3 = inlined_call_operand.vmem [shape: bf16[3,128,512], index: 3, kind: input, shape index: {}]   ;;  %s4363_s1 = inlined_call_operand.vmem [shape: bf16[144,128], index: 1, kind: input, shape index: {}]   ;;  %s4364_s0 = inlined_call_operand.vmem [shape: bf16[144,128], index: 0, kind: input, shape index: {}]   ;;  %s4365_s2 = inlined_call_operand.vmem [shape: bf16[144,128], index: 2, kind: input, shape index: {}]   ;;  %s4366_s4 = inlined_call_operand.vmem [shape: f32[1,512], index: 4, kind: input, shape index: {}]   ;;  %s4367_s5 = inlined_call_operand.vmem [shape: f32[8,144], index: 5, kind: input, shape index: {}]   ;;  %s4368_s6 = inlined_call_operand.vmem [shape: f32[512,128], index: 6, kind: input, shape index: {}]   ;;  %s4369_s7 = inlined_call_operand.vmem [shape: f32[1,128], index: 7, kind: input, shape index: {}]   ;;  %s4370_s8 = inlined_call_operand.vmem [shape: f32[8,128], index: 8, kind: output, shape index: {}]  }
   0x1   :  { %v2198_v0 = vld [vmem:[%s4362_s3 + $0x1e0] sm:$0xf]  ;;  %v2665_v1 = vld [vmem:[%s4362_s3 + $0x1ec] sm:$0xf0]  ;;  %v2663_v2 = vld [vmem:[%s4362_s3 + $0x1e4] sm:$0xf] }
   0x2   :  { %v2199_v3 = vor.u32 %v2665_v1, %v2198_v0  ;;  %v2200_v4 = vld [vmem:[%s4362_s3 + $0x1f0] sm:$0xf0]  ;;  %v2206_v5 = vld [vmem:[%s4362_s3 + $0x1e8] sm:$0xf]  ;;  %v2666_v6 = vld [vmem:[%s4362_s3 + $0x1f4] sm:$0xf0] }
   0x3   :  { %v2203_v7 = vor.u32 %v2663_v2, %v2200_v4  ;;  %v2207_v8 = vor.u32 %v2666_v6, %v2206_v5  ;;  %v2664_v9 = vld [vmem:[%s4362_s3 + $0x1ec] sm:$0xf]  ;;  %v2208_v10 = vld [vmem:[%s4362_s3 + $0x1f8] sm:$0xf0]  ;;  %v2182_v11 = vld [vmem:[%s4362_s3 + $0x1c0] sm:$0xf] }
   0x4   :  { %362 = vmatpush.bf16.msra.mxu0 %v2199_v3  ;;  %v2211_v12 = vor.u32 %v2664_v9, %v2208_v10  ;;  %v2661_v13 = vld [vmem:[%s4362_s3 + $0x1cc] sm:$0xf0]  ;;  %v2659_v14 = vld [vmem:[%s4362_s3 + $0x1c4] sm:$0xf]  ;;  %v2184_v15 = vld [vmem:[%s4362_s3 + $0x1d0] sm:$0xf0] }
   0x5   :  { %416 = vmatpush.bf16.msra.mxu1 %v2203_v7  ;;  %470 = vmatpush.bf16.msra.mxu2 %v2207_v8  ;;  %v2183_v16 = vor.u32 %v2661_v13, %v2182_v11  ;;  %v2187_v17 = vor.u32 %v2659_v14, %v2184_v15  ;;  %v2190_v18 = vld [vmem:[%s4362_s3 + $0x1c8] sm:$0xf]  ;;  %v2662_v19 = vld [vmem:[%s4362_s3 + $0x1d4] sm:$0xf0]  ;;  %v2660_v20 = vld [vmem:[%s4362_s3 + $0x1cc] sm:$0xf] }
   0x6   :  { %524 = vmatpush.bf16.msra.mxu3 %v2211_v12  ;;  %v2191_v21 = vor.u32 %v2662_v19, %v2190_v18  ;;  %v2192_v22 = vld [vmem:[%s4362_s3 + $0x1d8] sm:$0xf0]  ;;  %v2166_v23 = vld [vmem:[%s4362_s3 + $0x1a0] sm:$0xf]  ;;  %v2657_v24 = vld [vmem:[%s4362_s3 + $0x1ac] sm:$0xf0] }
   0x7   :  { %v2195_v25 = vor.u32 %v2660_v20, %v2192_v22  ;;  %v2655_v26 = vld [vmem:[%s4362_s3 + $0x1a4] sm:$0xf]  ;;  %v2168_v27 = vld [vmem:[%s4362_s3 + $0x1b0] sm:$0xf0]  ;;  %v2174_v28 = vld [vmem:[%s4362_s3 + $0x1a8] sm:$0xf]  ;;  %v2167_v29 = vor.u32 %v2657_v24, %v2166_v23 }
   0x8   :  { %363 = vmatpush.bf16.msra.mxu0 %v2183_v16  ;;  %v2658_v30 = vld [vmem:[%s4362_s3 + $0x1b4] sm:$0xf0]  ;;  %v2656_v31 = vld [vmem:[%s4362_s3 + $0x1ac] sm:$0xf]  ;;  %v2176_v32 = vld [vmem:[%s4362_s3 + $0x1b8] sm:$0xf0]  ;;  %v2171_v33 = vor.u32 %v2655_v26, %v2168_v27 }
   0x9   :  { %417 = vmatpush.bf16.msra.mxu1 %v2187_v17  ;;  %471 = vmatpush.bf16.msra.mxu2 %v2191_v21  ;;  %v2175_v34 = vor.u32 %v2658_v30, %v2174_v28  ;;  %v2150_v35 = vld [vmem:[%s4362_s3 + $0x180] sm:$0xf]  ;;  %v2653_v36 = vld [vmem:[%s4362_s3 + $0x18c] sm:$0xf0]  ;;  %v2651_v37 = vld [vmem:[%s4362_s3 + $0x184] sm:$0xf]  ;;  %v2179_v38 = vor.u32 %v2656_v31, %v2176_v32 }
   0xa   :  { %525 = vmatpush.bf16.msra.mxu3 %v2195_v25  ;;  %v2152_v39 = vld [vmem:[%s4362_s3 + $0x190] sm:$0xf0]  ;;  %v2158_v40 = vld [vmem:[%s4362_s3 + $0x188] sm:$0xf]  ;;  %v2654_v41 = vld [vmem:[%s4362_s3 + $0x194] sm:$0xf0]  ;;  %v2151_v44 = vor.u32 %v2653_v36, %v2150_v35 }
   0xb   :  { %v2652_v42 = vld [vmem:[%s4362_s3 + $0x18c] sm:$0xf]  ;;  %v2160_v43 = vld [vmem:[%s4362_s3 + $0x198] sm:$0xf0]  ;;  %v2155_v45 = vor.u32 %v2651_v37, %v2152_v39  ;;  %v2159_v46 = vor.u32 %v2654_v41, %v2158_v40  ;;  %v2134_v47 = vld [vmem:[%s4362_s3 + $0x160] sm:$0xf] }
   0xc   :  { %364 = vmatpush.bf16.msra.mxu0 %v2167_v29  ;;  %v2649_v48 = vld [vmem:[%s4362_s3 + $0x16c] sm:$0xf0]  ;;  %v2647_v49 = vld [vmem:[%s4362_s3 + $0x164] sm:$0xf]  ;;  %v2163_v50 = vor.u32 %v2652_v42, %v2160_v43  ;;  %v2136_v51 = vld [vmem:[%s4362_s3 + $0x170] sm:$0xf0] }
   0xd   :  { %418 = vmatpush.bf16.msra.mxu1 %v2171_v33  ;;  %472 = vmatpush.bf16.msra.mxu2 %v2175_v34  ;;  %v2142_v52 = vld [vmem:[%s4362_s3 + $0x168] sm:$0xf]  ;;  %v2650_v53 = vld [vmem:[%s4362_s3 + $0x174] sm:$0xf0]  ;;  %v2648_v54 = vld [vmem:[%s4362_s3 + $0x16c] sm:$0xf]  ;;  %v2135_v56 = vor.u32 %v2649_v48, %v2134_v47  ;;  %v2139_v57 = vor.u32 %v2647_v49, %v2136_v51 }
   0xe   :  { %526 = vmatpush.bf16.msra.mxu3 %v2179_v38  ;;  %v2144_v55 = vld [vmem:[%s4362_s3 + $0x178] sm:$0xf0]  ;;  %v2143_v58 = vor.u32 %v2650_v53, %v2142_v52  ;;  %v2118_v59 = vld [vmem:[%s4362_s3 + $0x140] sm:$0xf]  ;;  %v2645_v60 = vld [vmem:[%s4362_s3 + $0x14c] sm:$0xf0] }
   0xf   :  { %v2643_v61 = vld [vmem:[%s4362_s3 + $0x144] sm:$0xf]  ;;  %v2147_v62 = vor.u32 %v2648_v54, %v2144_v55  ;;  %v2120_v63 = vld [vmem:[%s4362_s3 + $0x150] sm:$0xf0]  ;;  %v2126_v0 = vld [vmem:[%s4362_s3 + $0x148] sm:$0xf]  ;;  %v2119_v4 = vor.u32 %v2645_v60, %v2118_v59 }
  0x10   :  { %365 = vmatpush.bf16.msra.mxu0 %v2151_v44  ;;  %v2646_v1 = vld [vmem:[%s4362_s3 + $0x154] sm:$0xf0]  ;;  %v2644_v2 = vld [vmem:[%s4362_s3 + $0x14c] sm:$0xf]  ;;  %v2128_v3 = vld [vmem:[%s4362_s3 + $0x158] sm:$0xf0]  ;;  %v2123_v5 = vor.u32 %v2643_v61, %v2120_v63 }
  0x11   :  { %419 = vmatpush.bf16.msra.mxu1 %v2155_v45  ;;  %473 = vmatpush.bf16.msra.mxu2 %v2159_v46  ;;  %v2127_v6 = vor.u32 %v2646_v1, %v2126_v0  ;;  %v2102_v7 = vld [vmem:[%s4362_s3 + $0x120] sm:$0xf]  ;;  %v2641_v8 = vld [vmem:[%s4362_s3 + $0x12c] sm:$0xf0]  ;;  %v2639_v9 = vld [vmem:[%s4362_s3 + $0x124] sm:$0xf]  ;;  %v2131_v10 = vor.u32 %v2644_v2, %v2128_v3 }
  0x12   :  { %527 = vmatpush.bf16.msra.mxu3 %v2163_v50  ;;  %v2104_v11 = vld [vmem:[%s4362_s3 + $0x130] sm:$0xf0]  ;;  %v2110_v12 = vld [vmem:[%s4362_s3 + $0x128] sm:$0xf]  ;;  %v2642_v13 = vld [vmem:[%s4362_s3 + $0x134] sm:$0xf0]  ;;  %v2103_v16 = vor.u32 %v2641_v8, %v2102_v7 }
  0x13   :  { %v2640_v14 = vld [vmem:[%s4362_s3 + $0x12c] sm:$0xf]  ;;  %v2112_v15 = vld [vmem:[%s4362_s3 + $0x138] sm:$0xf0]  ;;  %v2107_v17 = vor.u32 %v2639_v9, %v2104_v11  ;;  %v2111_v18 = vor.u32 %v2642_v13, %v2110_v12  ;;  %v2086_v19 = vld [vmem:[%s4362_s3 + $0x100] sm:$0xf] }
  0x14   :  { %366 = vmatpush.bf16.msra.mxu0 %v2135_v56  ;;  %v2637_v20 = vld [vmem:[%s4362_s3 + $0x10c] sm:$0xf0]  ;;  %v2635_v21 = vld [vmem:[%s4362_s3 + $0x104] sm:$0xf]  ;;  %v2115_v22 = vor.u32 %v2640_v14, %v2112_v15  ;;  %v2088_v23 = vld [vmem:[%s4362_s3 + $0x110] sm:$0xf0] }
  0x15   :  { %420 = vmatpush.bf16.msra.mxu1 %v2139_v57  ;;  %474 = vmatpush.bf16.msra.mxu2 %v2143_v58  ;;  %v2094_v24 = vld [vmem:[%s4362_s3 + $0x108] sm:$0xf]  ;;  %v2638_v25 = vld [vmem:[%s4362_s3 + $0x114] sm:$0xf0]  ;;  %v2636_v26 = vld [vmem:[%s4362_s3 + $0x10c] sm:$0xf]  ;;  %v2087_v28 = vor.u32 %v2637_v20, %v2086_v19  ;;  %v2091_v29 = vor.u32 %v2635_v21, %v2088_v23 }
  0x16   :  { %528 = vmatpush.bf16.msra.mxu3 %v2147_v62  ;;  %v2096_v27 = vld [vmem:[%s4362_s3 + $0x118] sm:$0xf0]  ;;  %v2095_v30 = vor.u32 %v2638_v25, %v2094_v24  ;;  %v2585_v32 = vld [vmem:[%s4363_s1] sm:$0xff]  ;;  %v2586_v33 = vld [vmem:[%s4363_s1 + $0x8] sm:$0xff] }
  0x17   :  { %v2099_v31 = vor.u32 %v2636_v26, %v2096_v27  ;;  %v2587_v34 = vld [vmem:[%s4363_s1 + $0x10] sm:$0xff]  ;;  %v2588_v35 = vld [vmem:[%s4363_s1 + $0x18] sm:$0xff]  ;;  %v2589_v36 = vld [vmem:[%s4363_s1 + $0x20] sm:$0xff] }
  0x18   :  { %367 = vmatpush.bf16.msra.mxu0 %v2119_v4  ;;  %v2590_v37 = vld [vmem:[%s4363_s1 + $0x28] sm:$0xff]  ;;  %v2362_v38 = vld [vmem:[%s4362_s3 + $0xe0] sm:$0xf]  ;;  %v2633_v39 = vld [vmem:[%s4362_s3 + $0xec] sm:$0xf0] }
  0x19   :  { %421 = vmatpush.bf16.msra.mxu1 %v2123_v5  ;;  %475 = vmatpush.bf16.msra.mxu2 %v2127_v6  ;;  %v2631_v40 = vld [vmem:[%s4362_s3 + $0xe4] sm:$0xf]  ;;  %v2363_v41 = vor.u32 %v2633_v39, %v2362_v38  ;;  %v2364_v42 = vld [vmem:[%s4362_s3 + $0xf0] sm:$0xf0]  ;;  %v2370_v43 = vld [vmem:[%s4362_s3 + $0xe8] sm:$0xf] }
  0x1a   :  { %529 = vmatpush.bf16.msra.mxu3 %v2131_v10  ;;  %v2634_v44 = vld [vmem:[%s4362_s3 + $0xf4] sm:$0xf0]  ;;  %v2367_v45 = vor.u32 %v2631_v40, %v2364_v42  ;;  %v2632_v47 = vld [vmem:[%s4362_s3 + $0xec] sm:$0xf]  ;;  %v2372_v48 = vld [vmem:[%s4362_s3 + $0xf8] sm:$0xf0] }
  0x1b   :  { %v2371_v46 = vor.u32 %v2634_v44, %v2370_v43  ;;  %v2346_v49 = vld [vmem:[%s4362_s3 + $0xc0] sm:$0xf]  ;;  %v2375_v50 = vor.u32 %v2632_v47, %v2372_v48  ;;  %v2629_v51 = vld [vmem:[%s4362_s3 + $0xcc] sm:$0xf0]  ;;  %v2627_v52 = vld [vmem:[%s4362_s3 + $0xc4] sm:$0xf] }
  0x1c   :  { %368 = vmatpush.bf16.msra.mxu0 %v2103_v16  ;;  %v2348_v53 = vld [vmem:[%s4362_s3 + $0xd0] sm:$0xf0]  ;;  %v2347_v54 = vor.u32 %v2629_v51, %v2346_v49  ;;  %v2354_v56 = vld [vmem:[%s4362_s3 + $0xc8] sm:$0xf]  ;;  %v2630_v57 = vld [vmem:[%s4362_s3 + $0xd4] sm:$0xf0] }
  0x1d   :  { %422 = vmatpush.bf16.msra.mxu1 %v2107_v17  ;;  %476 = vmatpush.bf16.msra.mxu2 %v2111_v18  ;;  %v2351_v55 = vor.u32 %v2627_v52, %v2348_v53  ;;  %v2628_v58 = vld [vmem:[%s4362_s3 + $0xcc] sm:$0xf]  ;;  %v2355_v59 = vor.u32 %v2630_v57, %v2354_v56  ;;  %v2356_v60 = vld [vmem:[%s4362_s3 + $0xd8] sm:$0xf0]  ;;  %v2330_v61 = vld [vmem:[%s4362_s3 + $0xa0] sm:$0xf] }
  0x1e   :  { %530 = vmatpush.bf16.msra.mxu3 %v2115_v22  ;;  %v2625_v62 = vld [vmem:[%s4362_s3 + $0xac] sm:$0xf0]  ;;  %v2359_v63 = vor.u32 %v2628_v58, %v2356_v60  ;;  %v2623_v0 = vld [vmem:[%s4362_s3 + $0xa4] sm:$0xf]  ;;  %v2332_v1 = vld [vmem:[%s4362_s3 + $0xb0] sm:$0xf0] }
  0x1f   :  { %v2338_v2 = vld [vmem:[%s4362_s3 + $0xa8] sm:$0xf]  ;;  %v2331_v3 = vor.u32 %v2625_v62, %v2330_v61  ;;  %v2626_v4 = vld [vmem:[%s4362_s3 + $0xb4] sm:$0xf0]  ;;  %v2624_v5 = vld [vmem:[%s4362_s3 + $0xac] sm:$0xf]  ;;  %v2335_v7 = vor.u32 %v2623_v0, %v2332_v1 }
  0x20   :  { %369 = vmatpush.bf16.msra.mxu0 %v2087_v28  ;;  %v2340_v6 = vld [vmem:[%s4362_s3 + $0xb8] sm:$0xf0]  ;;  %v2339_v8 = vor.u32 %v2626_v4, %v2338_v2  ;;  %v2591_v10 = vld [vmem:[%s4363_s1 + $0x30] sm:$0xff]  ;;  %v2314_v11 = vld [vmem:[%s4362_s3 + $0x80] sm:$0xf] }
  0x21   :  { %423 = vmatpush.bf16.msra.mxu1 %v2091_v29  ;;  %477 = vmatpush.bf16.msra.mxu2 %v2095_v30  ;;  %v2343_v9 = vor.u32 %v2624_v5, %v2340_v6  ;;  %v2621_v12 = vld [vmem:[%s4362_s3 + $0x8c] sm:$0xf0]  ;;  %v2619_v13 = vld [vmem:[%s4362_s3 + $0x84] sm:$0xf]  ;;  %v2316_v15 = vld [vmem:[%s4362_s3 + $0x90] sm:$0xf0] }
  0x22   :  { %531 = vmatpush.bf16.msra.mxu3 %v2099_v31  ;;  %v2315_v14 = vor.u32 %v2621_v12, %v2314_v11  ;;  %v2322_v16 = vld [vmem:[%s4362_s3 + $0x88] sm:$0xf]  ;;  %v2622_v17 = vld [vmem:[%s4362_s3 + $0x94] sm:$0xf0]  ;;  %v2319_v18 = vor.u32 %v2619_v13, %v2316_v15  ;;  %v2620_v20 = vld [vmem:[%s4362_s3 + $0x8c] sm:$0xf] }
  0x23   :  { %370 = vmatmul.bf16.vlgmr.msra.gmra.mxu0 %v2585_v32  ;;  %v2323_v19 = vor.u32 %v2622_v17, %v2322_v16  ;;  %v2324_v21 = vld [vmem:[%s4362_s3 + $0x98] sm:$0xf0]  ;;  %v2298_v23 = vld [vmem:[%s4362_s3 + $0x60] sm:$0xf]  ;;  %v2617_v24 = vld [vmem:[%s4362_s3 + $0x6c] sm:$0xf0] }
  0x24   :  { %424 = vmatmul.bf16.vlgmr.msra.gmra.mxu1 %v2585_v32  ;;  %478 = vmatmul.bf16.vlgmr.msra.gmra.mxu2 %v2585_v32  ;;  %v2327_v22 = vor.u32 %v2620_v20, %v2324_v21  ;;  %v2615_v25 = vld [vmem:[%s4362_s3 + $0x64] sm:$0xf]  ;;  %v2299_v26 = vor.u32 %v2617_v24, %v2298_v23  ;;  %v2300_v27 = vld [vmem:[%s4362_s3 + $0x70] sm:$0xf0]  ;;  %v2306_v28 = vld [vmem:[%s4362_s3 + $0x68] sm:$0xf] }
  0x25   :  { %532 = vmatmul.bf16.vlgmr.msra.gmra.mxu3 %v2585_v32  ;;  %792 = vmatpush.bf16.msrb.mxu0 %v2363_v41  ;;  %v2618_v29 = vld [vmem:[%s4362_s3 + $0x74] sm:$0xf0]  ;;  %v2303_v30 = vor.u32 %v2615_v25, %v2300_v27  ;;  %v2616_v32 = vld [vmem:[%s4362_s3 + $0x6c] sm:$0xf]  ;;  %v2284_v39 = vld [vmem:[%s4362_s3 + $0x50] sm:$0xf0] }
  0x26   :  { %846 = vmatpush.bf16.msrb.mxu1 %v2367_v45  ;;  %900 = vmatpush.bf16.msrb.mxu2 %v2371_v46  ;;  %v2307_v31 = vor.u32 %v2618_v29, %v2306_v28  ;;  %v2290_v40 = vld [vmem:[%s4362_s3 + $0x48] sm:$0xf]  ;;  %v2614_v41 = vld [vmem:[%s4362_s3 + $0x54] sm:$0xf0]  ;;  %v2612_v44 = vld [vmem:[%s4362_s3 + $0x4c] sm:$0xf] }
  0x27   :  { %954 = vmatpush.bf16.msrb.mxu3 %v2375_v50  ;;  %v2291_v43 = vor.u32 %v2614_v41, %v2290_v40  ;;  %v2292_v45 = vld [vmem:[%s4362_s3 + $0x58] sm:$0xf0]  ;;  %v2266_v46 = vld [vmem:[%s4362_s3 + $0x20] sm:$0xf]  ;;  %v2609_v48 = vld [vmem:[%s4362_s3 + $0x2c] sm:$0xf0] }
  0x28   :  { %v2295_v47 = vor.u32 %v2612_v44, %v2292_v45  ;;  %v2607_v49 = vld [vmem:[%s4362_s3 + $0x24] sm:$0xf]  ;;  %v2268_v50 = vld [vmem:[%s4362_s3 + $0x30] sm:$0xf0]  ;;  %v2267_v51 = vor.u32 %v2609_v48, %v2266_v46  ;;  %v2274_v53 = vld [vmem:[%s4362_s3 + $0x28] sm:$0xf] }
  0x29   :  { %793 = vmatpush.bf16.msrb.mxu0 %v2347_v54  ;;  %v2271_v52 = vor.u32 %v2607_v49, %v2268_v50  ;;  %v2610_v54 = vld [vmem:[%s4362_s3 + $0x34] sm:$0xf0]  ;;  %v2276_v56 = vld [vmem:[%s4362_s3 + $0x38] sm:$0xf0]  ;;  %v2250_v60 = vld [vmem:[%s4362_s3] sm:$0xf] }
  0x2a   :  { %847 = vmatpush.bf16.msrb.mxu1 %v2351_v55  ;;  %901 = vmatpush.bf16.msrb.mxu2 %v2355_v59  ;;  %v2608_v55 = vld [vmem:[%s4362_s3 + $0x2c] sm:$0xf]  ;;  %v2275_v57 = vor.u32 %v2610_v54, %v2274_v53  ;;  %v2592_v58 = vld [vmem:[%s4363_s1 + $0x38] sm:$0xff]  ;;  %v2605_v61 = vld [vmem:[%s4362_s3 + $0xc] sm:$0xf0] }
  0x2b   :  { %955 = vmatpush.bf16.msrb.mxu3 %v2359_v63  ;;  %v2279_v59 = vor.u32 %v2608_v55, %v2276_v56  ;;  %v2603_v62 = vld [vmem:[%s4362_s3 + $0x4] sm:$0xf]  ;;  %v2251_v63 = vor.u32 %v2605_v61, %v2250_v60  ;;  %v2252_v0 = vld [vmem:[%s4362_s3 + $0x10] sm:$0xf0]  ;;  %v2258_v1 = vld [vmem:[%s4362_s3 + $0x8] sm:$0xf] }
  0x2c   :  { %v2606_v2 = vld [vmem:[%s4362_s3 + $0x14] sm:$0xf0]  ;;  %v2604_v5 = vld [vmem:[%s4362_s3 + $0xc] sm:$0xf]  ;;  %v2260_v6 = vld [vmem:[%s4362_s3 + $0x18] sm:$0xf0] }
  0x2d   :  { %794 = vmatpush.bf16.msrb.mxu0 %v2331_v3  ;;  %v2255_v3 = vor.u32 %v2603_v62, %v2252_v0  ;;  %v2259_v4 = vor.u32 %v2606_v2, %v2258_v1  ;;  %v2576_v16 = vld [vmem:[%s4364_s0] sm:$0xff]  ;;  %v2577_v25 = vld [vmem:[%s4364_s0 + $0x8] sm:$0xff]  ;;  %v2697_v2 = vld [vmem:[%s4362_s3 + $0x2ec] sm:$0xf0] }
  0x2e   :  { %848 = vmatpush.bf16.msrb.mxu1 %v2335_v7  ;;  %902 = vmatpush.bf16.msrb.mxu2 %v2339_v8  ;;  %v2263_v7 = vor.u32 %v2604_v5, %v2260_v6  ;;  %v2593_v8 = vld [vmem:[%s4363_s1 + $0x40] sm:$0xff]  ;;  %v2581_v61 = vld [vmem:[%s4364_s0 + $0x28] sm:$0xff]  ;;  %v2560_v5 = vld [vmem:[%s4362_s3 + $0x2f0] sm:$0xf0] }
  0x2f   :  { %956 = vmatpush.bf16.msrb.mxu3 %v2343_v9  ;;  %v2558_v1 = vld [vmem:[%s4362_s3 + $0x2e0] sm:$0xf]  ;;  %v2566_v6 = vld [vmem:[%s4362_s3 + $0x2e8] sm:$0xf] }
  0x31   :  { %795 = vmatpush.bf16.msrb.mxu0 %v2315_v14 }
  0x32   :  { %849 = vmatpush.bf16.msrb.mxu1 %v2319_v18  ;;  %903 = vmatpush.bf16.msrb.mxu2 %v2323_v19 }
  0x33   :  { %375 = vmatmul.bf16.gmra.mxu0 %v2586_v33  ;;  %957 = vmatpush.bf16.msrb.mxu3 %v2327_v22 }
  0x34   :  { %429 = vmatmul.bf16.gmra.mxu1 %v2586_v33  ;;  %483 = vmatmul.bf16.gmra.mxu2 %v2586_v33 }
  0x35   :  { %537 = vmatmul.bf16.gmra.mxu3 %v2586_v33  ;;  %v2308_v33 = vld [vmem:[%s4362_s3 + $0x78] sm:$0xf0]  ;;  %796 = vmatpush.bf16.msrb.mxu0 %v2299_v26 }
  0x36   :  { %850 = vmatpush.bf16.msrb.mxu1 %v2303_v30  ;;  %904 = vmatpush.bf16.msrb.mxu2 %v2307_v31 }
  0x3a   :  { %905 = vmatpush.bf16.msrb.mxu2 %v2291_v43  ;;  %v2579_v43 = vld [vmem:[%s4364_s0 + $0x18] sm:$0xff] }
  0x3e   :  { %906 = vmatpush.bf16.msrb.mxu2 %v2275_v57 }
  0x42   :  { %907 = vmatpush.bf16.msrb.mxu2 %v2259_v4  ;;  %v2559_v4 = vor.u32 %v2697_v2, %v2558_v1  ;;  %v2693_v1 = vld [vmem:[%s4362_s3 + $0x2cc] sm:$0xf0]  ;;  %v2691_v2 = vld [vmem:[%s4362_s3 + $0x2c4] sm:$0xf] }
  0x43   :  { %380 = vmatmul.bf16.gmra.mxu0 %v2587_v34 }
  0x44   :  { %434 = vmatmul.bf16.gmra.mxu1 %v2587_v34  ;;  %488 = vmatmul.bf16.gmra.mxu2 %v2587_v34 }
  0x45   :  { %542 = vmatmul.bf16.gmra.mxu3 %v2587_v34  ;;  %v2311_v34 = vor.u32 %v2616_v32, %v2308_v33 }
  0x47   :  { %958 = vmatpush.bf16.msrb.mxu3 %v2311_v34  ;;  %v2578_v34 = vld [vmem:[%s4364_s0 + $0x10] sm:$0xff] }
  0x4b   :  { %959 = vmatpush.bf16.msrb.mxu3 %v2295_v47 }
  0x4f   :  { %960 = vmatpush.bf16.msrb.mxu3 %v2279_v59 }
  0x53   :  { %385 = vmatmul.bf16.gmra.mxu0 %v2588_v35  ;;  %961 = vmatpush.bf16.msrb.mxu3 %v2263_v7  ;;  %v2698_v7 = vld [vmem:[%s4362_s3 + $0x2f4] sm:$0xf0] }
  0x54   :  { %439 = vmatmul.bf16.gmra.mxu1 %v2588_v35  ;;  %493 = vmatmul.bf16.gmra.mxu2 %v2588_v35 }
  0x55   :  { %547 = vmatmul.bf16.gmra.mxu3 %v2588_v35  ;;  %v2282_v35 = vld [vmem:[%s4362_s3 + $0x40] sm:$0xf] }
  0x63   :  { %390 = vmatmul.bf16.gmra.mxu0 %v2589_v36 }
  0x64   :  { %444 = vmatmul.bf16.gmra.mxu1 %v2589_v36  ;;  %498 = vmatmul.bf16.gmra.mxu2 %v2589_v36 }
  0x65   :  { %552 = vmatmul.bf16.gmra.mxu3 %v2589_v36  ;;  %v2613_v36 = vld [vmem:[%s4362_s3 + $0x4c] sm:$0xf0] }
  0x66   :  { %v2283_v38 = vor.u32 %v2613_v36, %v2282_v35 }
  0x68   :  { %797 = vmatpush.bf16.msrb.mxu0 %v2283_v38 }
  0x6c   :  { %798 = vmatpush.bf16.msrb.mxu0 %v2267_v51 }
  0x70   :  { %799 = vmatpush.bf16.msrb.mxu0 %v2251_v63 }
  0x73   :  { %395 = vmatmul.bf16.gmra.mxu0 %v2590_v37 }
  0x74   :  { %449 = vmatmul.bf16.gmra.mxu1 %v2590_v37  ;;  %503 = vmatmul.bf16.gmra.mxu2 %v2590_v37 }
  0x75   :  { %557 = vmatmul.bf16.gmra.mxu3 %v2590_v37  ;;  %v2611_v37 = vld [vmem:[%s4362_s3 + $0x44] sm:$0xf]  ;;  %1255 = vmatpush.bf16.msra.mxu0 %v2559_v4 }
  0x76   :  { %v2287_v42 = vor.u32 %v2611_v37, %v2284_v39 }
  0x78   :  { %851 = vmatpush.bf16.msrb.mxu1 %v2287_v42 }
  0x7c   :  { %852 = vmatpush.bf16.msrb.mxu1 %v2271_v52  ;;  %v2580_v52 = vld [vmem:[%s4364_s0 + $0x20] sm:$0xff] }
  0x80   :  { %853 = vmatpush.bf16.msrb.mxu1 %v2255_v3  ;;  %v2695_v3 = vld [vmem:[%s4362_s3 + $0x2e4] sm:$0xf] }
  0x83   :  { %400 = vmatmul.bf16.gmra.mxu0 %v2591_v10 }
  0x84   :  { %454 = vmatmul.bf16.gmra.mxu1 %v2591_v10  ;;  %508 = vmatmul.bf16.gmra.mxu2 %v2591_v10 }
  0x85   :  { %562 = vmatmul.bf16.gmra.mxu3 %v2591_v10 }
  0x93   :  { %405 = vmatmul.bf16.gmra.mxu0 %v2592_v58 }
  0x94   :  { %459 = vmatmul.bf16.gmra.mxu1 %v2592_v58  ;;  %513 = vmatmul.bf16.gmra.mxu2 %v2592_v58 }
  0x95   :  { %567 = vmatmul.bf16.gmra.mxu3 %v2592_v58 }
  0xa0   :  { %v3156_v9 = vpop.f32.mrf.mxu0 }
  0xa1   :  { %v3158_v10 = vpop.f32.mrf.mxu1 }
  0xa3   :  { %410 = vmatmul.bf16.gmra.mxu0 %v2593_v8 }
  0xa4   :  { %464 = vmatmul.bf16.gmra.mxu1 %v2593_v8  ;;  %518 = vmatmul.bf16.gmra.mxu2 %v2593_v8 }
  0xa5   :  { %572 = vmatmul.bf16.gmra.mxu3 %v2593_v8  ;;  %v2563_v8 = vor.u32 %v2695_v3, %v2560_v5 }
  0xa7   :  { %v3160_v11 = vpop.f32.mrf.mxu2  ;;  %1309 = vmatpush.bf16.msra.mxu1 %v2563_v8  ;;  %v2694_v8 = vld [vmem:[%s4362_s3 + $0x2d4] sm:$0xf0] }
  0xa8   :  { %v3162_v12 = vpop.f32.mrf.mxu3  ;;  %v3164_v13 = vpop.f32.mrf.mxu0 }
  0xa9   :  { %v3166_v14 = vpop.f32.mrf.mxu1 }
  0xaf   :  { %v3168_v15 = vpop.f32.mrf.mxu2 }
  0xb0   :  { %v3173_v17 = vpop.f32.mrf.mxu3  ;;  %v3175_v18 = vpop.f32.mrf.mxu0 }
  0xb1   :  { %v3177_v19 = vpop.f32.mrf.mxu1 }
  0xb3   :  { %800 = vmatmul.bf16.vlgmr.msrb.gmra.mxu0 %v2576_v16 }
  0xb4   :  { %854 = vmatmul.bf16.vlgmr.msrb.gmra.mxu1 %v2576_v16  ;;  %908 = vmatmul.bf16.vlgmr.msrb.gmra.mxu2 %v2576_v16 }
  0xb5   :  { %962 = vmatmul.bf16.vlgmr.msrb.gmra.mxu3 %v2576_v16  ;;  %v2567_v16 = vor.u32 %v2698_v7, %v2566_v6  ;;  %v2544_v6 = vld [vmem:[%s4362_s3 + $0x2d0] sm:$0xf0]  ;;  %v2550_v7 = vld [vmem:[%s4362_s3 + $0x2c8] sm:$0xf] }
  0xb7   :  { %v3179_v20 = vpop.f32.mrf.mxu2  ;;  %1363 = vmatpush.bf16.msra.mxu2 %v2567_v16 }
  0xb8   :  { %v3181_v21 = vpop.f32.mrf.mxu3  ;;  %v3183_v22 = vpop.f32.mrf.mxu0 }
  0xb9   :  { %v3185_v23 = vpop.f32.mrf.mxu1 }
  0xbf   :  { %v3187_v24 = vpop.f32.mrf.mxu2 }
  0xc0   :  { %v3192_v26 = vpop.f32.mrf.mxu3  ;;  %v3194_v27 = vpop.f32.mrf.mxu0 }
  0xc1   :  { %v3196_v28 = vpop.f32.mrf.mxu1 }
  0xc3   :  { %805 = vmatmul.bf16.gmra.mxu0 %v2577_v25 }
  0xc4   :  { %859 = vmatmul.bf16.gmra.mxu1 %v2577_v25  ;;  %913 = vmatmul.bf16.gmra.mxu2 %v2577_v25 }
  0xc5   :  { %967 = vmatmul.bf16.gmra.mxu3 %v2577_v25  ;;  %v2696_v25 = vld [vmem:[%s4362_s3 + $0x2ec] sm:$0xf] }
  0xc7   :  { %v3198_v29 = vpop.f32.mrf.mxu2 }
  0xc8   :  { %v3200_v30 = vpop.f32.mrf.mxu3  ;;  %v3202_v31 = vpop.f32.mrf.mxu0 }
  0xc9   :  { %v3204_v32 = vpop.f32.mrf.mxu1 }
  0xcf   :  { %v3206_v33 = vpop.f32.mrf.mxu2 }
  0xd0   :  { %v3211_v35 = vpop.f32.mrf.mxu3  ;;  %v3213_v36 = vpop.f32.mrf.mxu0 }
  0xd1   :  { %v3215_v37 = vpop.f32.mrf.mxu1 }
  0xd3   :  { %810 = vmatmul.bf16.gmra.mxu0 %v2578_v34 }
  0xd4   :  { %864 = vmatmul.bf16.gmra.mxu1 %v2578_v34  ;;  %918 = vmatmul.bf16.gmra.mxu2 %v2578_v34 }
  0xd5   :  { %972 = vmatmul.bf16.gmra.mxu3 %v2578_v34  ;;  %v2568_v34 = vld [vmem:[%s4362_s3 + $0x2f8] sm:$0xf0] }
  0xd7   :  { %v3217_v38 = vpop.f32.mrf.mxu2 }
  0xd8   :  { %v3219_v39 = vpop.f32.mrf.mxu3  ;;  %v3221_v40 = vpop.f32.mrf.mxu0 }
  0xd9   :  { %4372 = vst [vmem:[#allocation2_spill] sm:$0xff] %v3219_v39  ;;  %v3223_v41 = vpop.f32.mrf.mxu1 }
  0xda   :  { %4373 = vst [vmem:[#allocation3_spill] sm:$0xff] %v3221_v40 }
  0xdb   :  { %4374 = vst [vmem:[#allocation4_spill] sm:$0xff] %v3223_v41 }
  0xdf   :  { %v3225_v42 = vpop.f32.mrf.mxu2 }
  0xe0   :  { %4375 = vst [vmem:[#allocation5_spill] sm:$0xff] %v3225_v42  ;;  %v3230_v44 = vpop.f32.mrf.mxu3  ;;  %v3232_v45 = vpop.f32.mrf.mxu0 }
  0xe1   :  { %4376 = vst [vmem:[#allocation6_spill] sm:$0xff] %v3230_v44  ;;  %v3234_v46 = vpop.f32.mrf.mxu1  ;;  %v2597_v44 = vld [vmem:[%s4365_s2 + $0x18] sm:$0xff] }
  0xe2   :  { %4377 = vst [vmem:[#allocation7_spill] sm:$0xff] %v3232_v45 }
  0xe3   :  { %4378 = vst [vmem:[#allocation8_spill] sm:$0xff] %v3234_v46  ;;  %815 = vmatmul.bf16.gmra.mxu0 %v2579_v43 }
  0xe4   :  { %869 = vmatmul.bf16.gmra.mxu1 %v2579_v43  ;;  %923 = vmatmul.bf16.gmra.mxu2 %v2579_v43 }
  0xe5   :  { %977 = vmatmul.bf16.gmra.mxu3 %v2579_v43  ;;  %v2571_v43 = vor.u32 %v2696_v25, %v2568_v34  ;;  %v2547_v25 = vor.u32 %v2691_v2, %v2544_v6  ;;  %v2551_v34 = vor.u32 %v2694_v8, %v2550_v7  ;;  %v2687_v2 = vld [vmem:[%s4362_s3 + $0x2a4] sm:$0xf]  ;;  %v2528_v6 = vld [vmem:[%s4362_s3 + $0x2b0] sm:$0xf0] }
  0xe6   :  { %v2531_v8 = vor.u32 %v2687_v2, %v2528_v6  ;;  %v2510_v2 = vld [vmem:[%s4362_s3 + $0x280] sm:$0xf]  ;;  %v2683_v6 = vld [vmem:[%s4362_s3 + $0x284] sm:$0xf] }
  0xe7   :  { %v3236_v47 = vpop.f32.mrf.mxu2  ;;  %1417 = vmatpush.bf16.msra.mxu3 %v2571_v43  ;;  %v2692_v43 = vld [vmem:[%s4362_s3 + $0x2cc] sm:$0xf]  ;;  %1310 = vmatpush.bf16.msra.mxu1 %v2547_v25  ;;  %v2536_v25 = vld [vmem:[%s4362_s3 + $0x2b8] sm:$0xf0] }
  0xe8   :  { %4379 = vst [vmem:[#allocation9_spill] sm:$0xff] %v3236_v47  ;;  %v3238_v48 = vpop.f32.mrf.mxu3  ;;  %v3240_v49 = vpop.f32.mrf.mxu0  ;;  %1364 = vmatpush.bf16.msra.mxu2 %v2551_v34  ;;  %v2582_v34 = vld [vmem:[%s4364_s0 + $0x30] sm:$0xff] }
  0xe9   :  { %4380 = vst [vmem:[#allocation10_spill] sm:$0xff] %v3238_v48  ;;  %v3242_v50 = vpop.f32.mrf.mxu1 }
  0xea   :  { %4381 = vst [vmem:[#allocation11_spill] sm:$0xff] %v3240_v49  ;;  %v2596_v49 = vld [vmem:[%s4365_s2 + $0x10] sm:$0xff] }
  0xeb   :  { %4382 = vst [vmem:[#allocation12_spill] sm:$0xff] %v3242_v50  ;;  %1311 = vmatpush.bf16.msra.mxu1 %v2531_v8  ;;  %v2518_v8 = vld [vmem:[%s4362_s3 + $0x288] sm:$0xf] }
  0xef   :  { %v3244_v51 = vpop.f32.mrf.mxu2 }
  0xf0   :  { %4383 = vst [vmem:[#allocation13_spill] sm:$0xff] %v3244_v51  ;;  %v3249_v53 = vpop.f32.mrf.mxu3  ;;  %v3251_v54 = vpop.f32.mrf.mxu0 }
  0xf1   :  { %4384 = vst [vmem:[#allocation14_spill] sm:$0xff] %v3249_v53  ;;  %v3253_v55 = vpop.f32.mrf.mxu1 }
  0xf2   :  { %4385 = vst [vmem:[#allocation15_spill] sm:$0xff] %v3251_v54 }
  0xf3   :  { %4386 = vst [vmem:[#allocation16_spill] sm:$0xff] %v3253_v55  ;;  %820 = vmatmul.bf16.gmra.mxu0 %v2580_v52 }
  0xf4   :  { %874 = vmatmul.bf16.gmra.mxu1 %v2580_v52  ;;  %928 = vmatmul.bf16.gmra.mxu2 %v2580_v52 }
  0xf5   :  { %982 = vmatmul.bf16.gmra.mxu3 %v2580_v52 }
  0xf7   :  { %v3255_v56 = vpop.f32.mrf.mxu2 }
  0xf8   :  { %4387 = vst [vmem:[#allocation17_spill] sm:$0xff] %v3255_v56  ;;  %v3257_v57 = vpop.f32.mrf.mxu3  ;;  %v3259_v58 = vpop.f32.mrf.mxu0 }
  0xf9   :  { %4388 = vst [vmem:[#allocation18_spill] sm:$0xff] %v3257_v57  ;;  %v3261_v59 = vpop.f32.mrf.mxu1 }
  0xfa   :  { %4389 = vst [vmem:[#allocation19_spill] sm:$0xff] %v3259_v58 }
  0xfb   :  { %4390 = vst [vmem:[#allocation20_spill] sm:$0xff] %v3261_v59 }
  0xff   :  { %v3263_v60 = vpop.f32.mrf.mxu2 }
 0x100   :  { %4391 = vst [vmem:[#allocation21_spill] sm:$0xff] %v3263_v60  ;;  %v3268_v62 = vpop.f32.mrf.mxu3  ;;  %v3270_v63 = vpop.f32.mrf.mxu0  ;;  %v2595_v60 = vld [vmem:[%s4365_s2 + $0x8] sm:$0xff] }
 0x101   :  { %4392 = vst [vmem:[#allocation22_spill] sm:$0xff] %v3268_v62  ;;  %v3272_v0 = vpop.f32.mrf.mxu1 }
 0x102   :  { %4393 = vst [vmem:[#allocation23_spill] sm:$0xff] %v3270_v63 }
 0x103   :  { %4394 = vst [vmem:[#allocation24_spill] sm:$0xff] %v3272_v0  ;;  %825 = vmatmul.bf16.gmra.mxu0 %v2581_v61 }
 0x104   :  { %879 = vmatmul.bf16.gmra.mxu1 %v2581_v61  ;;  %933 = vmatmul.bf16.gmra.mxu2 %v2581_v61 }
 0x105   :  { %987 = vmatmul.bf16.gmra.mxu3 %v2581_v61  ;;  %v2542_v61 = vld [vmem:[%s4362_s3 + $0x2c0] sm:$0xf] }
 0x106   :  { %v2543_v5 = vor.u32 %v2693_v1, %v2542_v61  ;;  %v2552_v61 = vld [vmem:[%s4362_s3 + $0x2d8] sm:$0xf0]  ;;  %v2526_v1 = vld [vmem:[%s4362_s3 + $0x2a0] sm:$0xf] }
 0x107   :  { %v3298_v52 = vpop.f32.mrf.mxu2 }
 0x108   :  { %4395 = vst [vmem:[#allocation25_spill] sm:$0xff] %v3298_v52  ;;  %v3309_v3 = vpop.f32.mrf.mxu3  ;;  %v3311_v4 = vpop.f32.mrf.mxu0  ;;  %1256 = vmatpush.bf16.msra.mxu0 %v2543_v5  ;;  %v2534_v5 = vld [vmem:[%s4362_s3 + $0x2a8] sm:$0xf] }
 0x109   :  { %4396 = vst [vmem:[#allocation26_spill] sm:$0xff] %v3309_v3  ;;  %v3322_v16 = vpop.f32.mrf.mxu1 }
 0x10a   :  { %4397 = vst [vmem:[#allocation27_spill] sm:$0xff] %v3311_v4  ;;  %v2555_v4 = vor.u32 %v2692_v43, %v2552_v61  ;;  %v2690_v43 = vld [vmem:[%s4362_s3 + $0x2b4] sm:$0xf0]  ;;  %v2688_v61 = vld [vmem:[%s4362_s3 + $0x2ac] sm:$0xf] }
 0x10b   :  { %4398 = vst [vmem:[#allocation28_spill] sm:$0xff] %v3322_v16  ;;  %v2689_v16 = vld [vmem:[%s4362_s3 + $0x2ac] sm:$0xf0]  ;;  %v2535_v3 = vor.u32 %v2690_v43, %v2534_v5 }
 0x10c   :  { %v2527_v7 = vor.u32 %v2689_v16, %v2526_v1  ;;  %1418 = vmatpush.bf16.msra.mxu3 %v2555_v4  ;;  %v2539_v16 = vor.u32 %v2688_v61, %v2536_v25  ;;  %v2685_v4 = vld [vmem:[%s4362_s3 + $0x28c] sm:$0xf0]  ;;  %v2686_v61 = vld [vmem:[%s4362_s3 + $0x294] sm:$0xf0] }
 0x10d   :  { %1365 = vmatpush.bf16.msra.mxu2 %v2535_v3  ;;  %v2512_v3 = vld [vmem:[%s4362_s3 + $0x290] sm:$0xf0] }
 0x10e   :  { %1257 = vmatpush.bf16.msra.mxu0 %v2527_v7  ;;  %v2511_v7 = vor.u32 %v2685_v4, %v2510_v2  ;;  %v2520_v2 = vld [vmem:[%s4362_s3 + $0x298] sm:$0xf0] }
 0x10f   :  { %v3357_v1 = vpop.f32.mrf.mxu2 }
 0x110   :  { %4399 = vst [vmem:[#allocation29_spill] sm:$0xff] %v3357_v1  ;;  %v3368_v5 = vpop.f32.mrf.mxu3  ;;  %v3370_v43 = vpop.f32.mrf.mxu0  ;;  %1419 = vmatpush.bf16.msra.mxu3 %v2539_v16  ;;  %v2515_v1 = vor.u32 %v2683_v6, %v2512_v3  ;;  %v2684_v16 = vld [vmem:[%s4362_s3 + $0x28c] sm:$0xf]  ;;  %v2681_v6 = vld [vmem:[%s4362_s3 + $0x26c] sm:$0xf0] }
 0x111   :  { %4400 = vst [vmem:[#allocation30_spill] sm:$0xff] %v3368_v5  ;;  %v3381_v25 = vpop.f32.mrf.mxu1  ;;  %v2519_v5 = vor.u32 %v2686_v61, %v2518_v8  ;;  %v2523_v4 = vor.u32 %v2684_v16, %v2520_v2  ;;  %v2679_v3 = vld [vmem:[%s4362_s3 + $0x264] sm:$0xf]  ;;  %v2682_v61 = vld [vmem:[%s4362_s3 + $0x274] sm:$0xf0] }
 0x112   :  { %4401 = vst [vmem:[#allocation31_spill] sm:$0xff] %v3370_v43  ;;  %1258 = vmatpush.bf16.msra.mxu0 %v2511_v7  ;;  %1312 = vmatpush.bf16.msra.mxu1 %v2515_v1  ;;  %v2494_v43 = vld [vmem:[%s4362_s3 + $0x260] sm:$0xf]  ;;  %v2496_v7 = vld [vmem:[%s4362_s3 + $0x270] sm:$0xf0] }
 0x113   :  { %4402 = vst [vmem:[#allocation32_spill] sm:$0xff] %v3381_v25  ;;  %830 = vmatmul.bf16.gmra.mxu0 %v2582_v34  ;;  %v2495_v8 = vor.u32 %v2681_v6, %v2494_v43  ;;  %v2502_v1 = vld [vmem:[%s4362_s3 + $0x268] sm:$0xf]  ;;  %1366 = vmatpush.bf16.msra.mxu2 %v2519_v5  ;;  %v2499_v16 = vor.u32 %v2679_v3, %v2496_v7  ;;  %v2680_v43 = vld [vmem:[%s4362_s3 + $0x26c] sm:$0xf] }
 0x114   :  { %884 = vmatmul.bf16.gmra.mxu1 %v2582_v34  ;;  %938 = vmatmul.bf16.gmra.mxu2 %v2582_v34  ;;  %v2503_v2 = vor.u32 %v2682_v61, %v2502_v1  ;;  %v2504_v6 = vld [vmem:[%s4362_s3 + $0x278] sm:$0xf0]  ;;  %v2677_v5 = vld [vmem:[%s4362_s3 + $0x24c] sm:$0xf0]  ;;  %v2675_v3 = vld [vmem:[%s4362_s3 + $0x244] sm:$0xf] }
 0x115   :  { %992 = vmatmul.bf16.gmra.mxu3 %v2582_v34  ;;  %v2507_v25 = vor.u32 %v2680_v43, %v2504_v6  ;;  %v2478_v34 = vld [vmem:[%s4362_s3 + $0x240] sm:$0xf]  ;;  %v2480_v1 = vld [vmem:[%s4362_s3 + $0x250] sm:$0xf0]  ;;  %v2486_v61 = vld [vmem:[%s4362_s3 + $0x248] sm:$0xf] }
 0x116   :  { %1420 = vmatpush.bf16.msra.mxu3 %v2523_v4  ;;  %1259 = vmatpush.bf16.msra.mxu0 %v2495_v8  ;;  %v2479_v8 = vor.u32 %v2677_v5, %v2478_v34  ;;  %v2483_v6 = vor.u32 %v2675_v3, %v2480_v1  ;;  %v2676_v34 = vld [vmem:[%s4362_s3 + $0x24c] sm:$0xf]  ;;  %v2488_v5 = vld [vmem:[%s4362_s3 + $0x258] sm:$0xf0]  ;;  %v2671_v3 = vld [vmem:[%s4362_s3 + $0x224] sm:$0xf] }
 0x117   :  { %v3413_v52 = vpop.f32.mrf.mxu2  ;;  %1313 = vmatpush.bf16.msra.mxu1 %v2499_v16  ;;  %v2678_v16 = vld [vmem:[%s4362_s3 + $0x254] sm:$0xf0]  ;;  %1367 = vmatpush.bf16.msra.mxu2 %v2503_v2  ;;  %v2673_v2 = vld [vmem:[%s4362_s3 + $0x22c] sm:$0xf0] }
 0x118   :  { %4403 = vst [vmem:[#allocation33_spill] sm:$0xff] %v3413_v52  ;;  %v3424_v7 = vpop.f32.mrf.mxu3  ;;  %v3426_v4 = vpop.f32.mrf.mxu0  ;;  %v2462_v52 = vld [vmem:[%s4362_s3 + $0x220] sm:$0xf] }
 0x119   :  { %4404 = vst [vmem:[#allocation34_spill] sm:$0xff] %v3424_v7  ;;  %v3437_v43 = vpop.f32.mrf.mxu1  ;;  %v2487_v7 = vor.u32 %v2678_v16, %v2486_v61  ;;  %v2463_v1 = vor.u32 %v2673_v2, %v2462_v52  ;;  %v2674_v61 = vld [vmem:[%s4362_s3 + $0x234] sm:$0xf0]  ;;  %v2472_v52 = vld [vmem:[%s4362_s3 + $0x238] sm:$0xf0] }
 0x11a   :  { %4405 = vst [vmem:[#allocation35_spill] sm:$0xff] %v3426_v4  ;;  %1421 = vmatpush.bf16.msra.mxu3 %v2507_v25  ;;  %1260 = vmatpush.bf16.msra.mxu0 %v2479_v8  ;;  %v2491_v4 = vor.u32 %v2676_v34, %v2488_v5  ;;  %v2464_v25 = vld [vmem:[%s4362_s3 + $0x230] sm:$0xf0]  ;;  %v2470_v8 = vld [vmem:[%s4362_s3 + $0x228] sm:$0xf]  ;;  %v2583_v5 = vld [vmem:[%s4364_s0 + $0x38] sm:$0xff] }
 0x11b   :  { %4406 = vst [vmem:[#allocation36_spill] sm:$0xff] %v3437_v43  ;;  %1314 = vmatpush.bf16.msra.mxu1 %v2483_v6  ;;  %v2467_v16 = vor.u32 %v2671_v3, %v2464_v25  ;;  %v2672_v34 = vld [vmem:[%s4362_s3 + $0x22c] sm:$0xf]  ;;  %1368 = vmatpush.bf16.msra.mxu2 %v2487_v7  ;;  %v2471_v6 = vor.u32 %v2674_v61, %v2470_v8  ;;  %v2446_v3 = vld [vmem:[%s4362_s3 + $0x200] sm:$0xf] }
 0x11c   :  { %v2475_v2 = vor.u32 %v2672_v34, %v2472_v52  ;;  %v2669_v25 = vld [vmem:[%s4362_s3 + $0x20c] sm:$0xf0]  ;;  %v2667_v7 = vld [vmem:[%s4362_s3 + $0x204] sm:$0xf]  ;;  %v2448_v61 = vld [vmem:[%s4362_s3 + $0x210] sm:$0xf0] }
 0x11d   :  { %v2670_v34 = vld [vmem:[%s4362_s3 + $0x214] sm:$0xf0] }
 0x11e   :  { %1422 = vmatpush.bf16.msra.mxu3 %v2491_v4  ;;  %1261 = vmatpush.bf16.msra.mxu0 %v2463_v1  ;;  %v2447_v1 = vor.u32 %v2669_v25, %v2446_v3  ;;  %v2668_v3 = vld [vmem:[%s4362_s3 + $0x20c] sm:$0xf]  ;;  %v2456_v25 = vld [vmem:[%s4362_s3 + $0x218] sm:$0xf0] }
 0x11f   :  { %v3472_v43 = vpop.f32.mrf.mxu2  ;;  %1315 = vmatpush.bf16.msra.mxu1 %v2467_v16  ;;  %v2454_v16 = vld [vmem:[%s4362_s3 + $0x208] sm:$0xf]  ;;  %1369 = vmatpush.bf16.msra.mxu2 %v2471_v6 }
 0x120   :  { %4407 = vst [vmem:[#allocation37_spill] sm:$0xff] %v3472_v43  ;;  %v3483_v8 = vpop.f32.mrf.mxu3  ;;  %v3485_v4 = vpop.f32.mrf.mxu0  ;;  %v2451_v43 = vor.u32 %v2667_v7, %v2448_v61 }
 0x121   :  { %4408 = vst [vmem:[#allocation38_spill] sm:$0xff] %v3483_v8  ;;  %v3496_v52 = vpop.f32.mrf.mxu1  ;;  %v2455_v8 = vor.u32 %v2670_v34, %v2454_v16 }
 0x122   :  { %4409 = vst [vmem:[#allocation39_spill] sm:$0xff] %v3485_v4  ;;  %1423 = vmatpush.bf16.msra.mxu3 %v2475_v2  ;;  %1262 = vmatpush.bf16.msra.mxu0 %v2447_v1  ;;  %v2459_v4 = vor.u32 %v2668_v3, %v2456_v25  ;;  %v2584_v2 = vld [vmem:[%s4364_s0 + $0x40] sm:$0xff] }
 0x123   :  { %4410 = vst [vmem:[#allocation40_spill] sm:$0xff] %v3496_v52  ;;  %835 = vmatmul.bf16.gmra.mxu0 %v2583_v5  ;;  %1316 = vmatpush.bf16.msra.mxu1 %v2451_v43 }
 0x124   :  { %889 = vmatmul.bf16.gmra.mxu1 %v2583_v5  ;;  %943 = vmatmul.bf16.gmra.mxu2 %v2583_v5 }
 0x125   :  { %997 = vmatmul.bf16.gmra.mxu3 %v2583_v5  ;;  %1370 = vmatpush.bf16.msra.mxu2 %v2455_v8 }
 0x126   :  { %1424 = vmatpush.bf16.msra.mxu3 %v2459_v4 }
 0x127   :  { %v3504_v6 = vpop.f32.mrf.mxu2 }
 0x128   :  { %4411 = vst [vmem:[#allocation41_spill] sm:$0xff] %v3504_v6  ;;  %v3506_v7 = vpop.f32.mrf.mxu3  ;;  %v3508_v61 = vpop.f32.mrf.mxu0 }
 0x129   :  { %4412 = vst [vmem:[#allocation42_spill] sm:$0xff] %v3506_v7  ;;  %v3510_v16 = vpop.f32.mrf.mxu1 }
 0x12a   :  { %4413 = vst [vmem:[#allocation43_spill] sm:$0xff] %v3508_v61 }
 0x12b   :  { %4414 = vst [vmem:[#allocation44_spill] sm:$0xff] %v3510_v16 }
 0x12f   :  { %v3512_v34 = vpop.f32.mrf.mxu2 }
 0x130   :  { %4415 = vst [vmem:[#allocation45_spill] sm:$0xff] %v3512_v34  ;;  %v3517_v43 = vpop.f32.mrf.mxu3  ;;  %v3519_v1 = vpop.f32.mrf.mxu0 }
 0x131   :  { %4416 = vst [vmem:[#allocation46_spill] sm:$0xff] %v3517_v43  ;;  %v3521_v5 = vpop.f32.mrf.mxu1  ;;  %v2594_v43 = vld [vmem:[%s4365_s2] sm:$0xff] }
 0x133   :  { %840 = vmatmul.bf16.gmra.mxu0 %v2584_v2 }
 0x134   :  { %894 = vmatmul.bf16.gmra.mxu1 %v2584_v2  ;;  %948 = vmatmul.bf16.gmra.mxu2 %v2584_v2 }
 0x135   :  { %1002 = vmatmul.bf16.gmra.mxu3 %v2584_v2 }
 0x137   :  { %v3523_v8 = vpop.f32.mrf.mxu2 }
 0x138   :  { %v3525_v4 = vpop.f32.mrf.mxu3  ;;  %v3527_v3 = vpop.f32.mrf.mxu0 }
 0x139   :  { %v3529_v25 = vpop.f32.mrf.mxu1 }
 0x13f   :  { %v3531_v34 = vpop.f32.mrf.mxu2 }
 0x140   :  { %v3536_v16 = vpop.f32.mrf.mxu3  ;;  %v3538_v61 = vpop.f32.mrf.mxu0 }
 0x141   :  { %v3540_v7 = vpop.f32.mrf.mxu1 }
 0x143   :  { %1263 = vmatmul.bf16.vlgmr.msra.gmra.mxu0 %v2594_v43 }
 0x144   :  { %1317 = vmatmul.bf16.vlgmr.msra.gmra.mxu1 %v2594_v43  ;;  %1371 = vmatmul.bf16.vlgmr.msra.gmra.mxu2 %v2594_v43 }
 0x145   :  { %1425 = vmatmul.bf16.vlgmr.msra.gmra.mxu3 %v2594_v43 }
 0x147   :  { %v3542_v2 = vpop.f32.mrf.mxu2 }
 0x148   :  { %v3544_v6 = vpop.f32.mrf.mxu3  ;;  %v3546_v52 = vpop.f32.mrf.mxu0 }
 0x149   :  { %v3548_v0 = vpop.f32.mrf.mxu1 }
 0x14f   :  { %v3550_v63 = vpop.f32.mrf.mxu2 }
 0x150   :  { %v3555_v59 = vpop.f32.mrf.mxu3  ;;  %v3557_v58 = vpop.f32.mrf.mxu0 }
 0x151   :  { %v3559_v56 = vpop.f32.mrf.mxu1 }
 0x153   :  { %1268 = vmatmul.bf16.gmra.mxu0 %v2595_v60 }
 0x154   :  { %1322 = vmatmul.bf16.gmra.mxu1 %v2595_v60  ;;  %1376 = vmatmul.bf16.gmra.mxu2 %v2595_v60 }
 0x155   :  { %1430 = vmatmul.bf16.gmra.mxu3 %v2595_v60 }
 0x157   :  { %v3561_v43 = vpop.f32.mrf.mxu2 }
 0x158   :  { %v3563_v55 = vpop.f32.mrf.mxu3  ;;  %v3565_v54 = vpop.f32.mrf.mxu0 }
 0x159   :  { %v3567_v51 = vpop.f32.mrf.mxu1 }
 0x15f   :  { %v3569_v50 = vpop.f32.mrf.mxu2 }
 0x160   :  { %v3574_v62 = vpop.f32.mrf.mxu3  ;;  %v3576_v57 = vpop.f32.mrf.mxu0 }
 0x161   :  { %v3578_v53 = vpop.f32.mrf.mxu1 }
 0x163   :  { %1273 = vmatmul.bf16.gmra.mxu0 %v2596_v49 }
 0x164   :  { %1327 = vmatmul.bf16.gmra.mxu1 %v2596_v49  ;;  %1381 = vmatmul.bf16.gmra.mxu2 %v2596_v49 }
 0x165   :  { %1435 = vmatmul.bf16.gmra.mxu3 %v2596_v49 }
 0x167   :  { %v3580_v60 = vpop.f32.mrf.mxu2 }
 0x168   :  { %v3582_v48 = vpop.f32.mrf.mxu3  ;;  %v3584_v47 = vpop.f32.mrf.mxu0 }
 0x169   :  { %4417 = vst [vmem:[#allocation47_spill] sm:$0xff] %v3582_v48  ;;  %v3586_v46 = vpop.f32.mrf.mxu1 }
 0x16a   :  { %4418 = vst [vmem:[#allocation48_spill] sm:$0xff] %v3584_v47 }
 0x16b   :  { %4419 = vst [vmem:[#allocation49_spill] sm:$0xff] %v3586_v46 }
 0x16f   :  { %v3588_v45 = vpop.f32.mrf.mxu2 }
 0x170   :  { %4420 = vst [vmem:[#allocation50_spill] sm:$0xff] %v3588_v45  ;;  %v3593_v42 = vpop.f32.mrf.mxu3  ;;  %v3595_v41 = vpop.f32.mrf.mxu0 }
 0x171   :  { %4421 = vst [vmem:[#allocation51_spill] sm:$0xff] %v3593_v42  ;;  %v3597_v40 = vpop.f32.mrf.mxu1 }
 0x172   :  { %4422 = vst [vmem:[#allocation52_spill] sm:$0xff] %v3595_v41  ;;  %v2598_v41 = vld [vmem:[%s4365_s2 + $0x20] sm:$0xff] }
 0x173   :  { %4423 = vst [vmem:[#allocation53_spill] sm:$0xff] %v3597_v40  ;;  %1278 = vmatmul.bf16.gmra.mxu0 %v2597_v44 }
 0x174   :  { %1332 = vmatmul.bf16.gmra.mxu1 %v2597_v44  ;;  %1386 = vmatmul.bf16.gmra.mxu2 %v2597_v44 }
 0x175   :  { %1440 = vmatmul.bf16.gmra.mxu3 %v2597_v44 }
 0x177   :  { %v3599_v49 = vpop.f32.mrf.mxu2 }
 0x178   :  { %4424 = vst [vmem:[#allocation54_spill] sm:$0xff] %v3599_v49  ;;  %v3601_v47 = vpop.f32.mrf.mxu3  ;;  %v3603_v46 = vpop.f32.mrf.mxu0 }
 0x179   :  { %4425 = vst [vmem:[#allocation55_spill] sm:$0xff] %v3601_v47  ;;  %v3605_v45 = vpop.f32.mrf.mxu1 }
 0x17a   :  { %4426 = vst [vmem:[#allocation56_spill] sm:$0xff] %v3603_v46 }
 0x17b   :  { %4427 = vst [vmem:[#allocation57_spill] sm:$0xff] %v3605_v45 }
 0x17f   :  { %v3607_v48 = vpop.f32.mrf.mxu2 }
 0x180   :  { %4428 = vst [vmem:[#allocation58_spill] sm:$0xff] %v3607_v48  ;;  %v3612_v42 = vpop.f32.mrf.mxu3  ;;  %v3614_v40 = vpop.f32.mrf.mxu0 }
 0x181   :  { %4429 = vst [vmem:[#allocation59_spill] sm:$0xff] %v3612_v42  ;;  %v3616_v39 = vpop.f32.mrf.mxu1 }
 0x182   :  { %4430 = vst [vmem:[#allocation60_spill] sm:$0xff] %v3614_v40  ;;  %v2599_v40 = vld [vmem:[%s4365_s2 + $0x28] sm:$0xff] }
 0x183   :  { %4431 = vst [vmem:[#allocation61_spill] sm:$0xff] %v3616_v39  ;;  %1283 = vmatmul.bf16.gmra.mxu0 %v2598_v41 }
 0x184   :  { %1337 = vmatmul.bf16.gmra.mxu1 %v2598_v41  ;;  %1391 = vmatmul.bf16.gmra.mxu2 %v2598_v41 }
 0x185   :  { %1445 = vmatmul.bf16.gmra.mxu3 %v2598_v41 }
 0x187   :  { %v3618_v44 = vpop.f32.mrf.mxu2 }
 0x188   :  { %4432 = vst [vmem:[#allocation62_spill] sm:$0xff] %v3618_v44  ;;  %v3620_v46 = vpop.f32.mrf.mxu3  ;;  %v3622_v45 = vpop.f32.mrf.mxu0 }
 0x189   :  { %4433 = vst [vmem:[#allocation63_spill] sm:$0xff] %v3620_v46  ;;  %v3624_v48 = vpop.f32.mrf.mxu1 }
 0x18a   :  { %4434 = vst [vmem:[#allocation64_spill] sm:$0xff] %v3622_v45 }
 0x18b   :  { %4435 = vst [vmem:[#allocation65_spill] sm:$0xff] %v3624_v48 }
 0x18f   :  { %v3626_v47 = vpop.f32.mrf.mxu2 }
 0x190   :  { %4436 = vst [vmem:[#allocation66_spill] sm:$0xff] %v3626_v47  ;;  %v3631_v42 = vpop.f32.mrf.mxu3  ;;  %v3633_v39 = vpop.f32.mrf.mxu0 }
 0x191   :  { %4437 = vst [vmem:[#allocation67_spill] sm:$0xff] %v3631_v42  ;;  %v3635_v49 = vpop.f32.mrf.mxu1 }
 0x192   :  { %4438 = vst [vmem:[#allocation68_spill] sm:$0xff] %v3633_v39  ;;  %v2600_v39 = vld [vmem:[%s4365_s2 + $0x30] sm:$0xff] }
 0x193   :  { %4439 = vst [vmem:[#allocation69_spill] sm:$0xff] %v3635_v49  ;;  %1288 = vmatmul.bf16.gmra.mxu0 %v2599_v40 }
 0x194   :  { %1342 = vmatmul.bf16.gmra.mxu1 %v2599_v40  ;;  %1396 = vmatmul.bf16.gmra.mxu2 %v2599_v40 }
 0x195   :  { %1450 = vmatmul.bf16.gmra.mxu3 %v2599_v40 }
 0x197   :  { %v3637_v41 = vpop.f32.mrf.mxu2 }
 0x198   :  { %4440 = vst [vmem:[#allocation70_spill] sm:$0xff] %v3637_v41  ;;  %v3639_v45 = vpop.f32.mrf.mxu3  ;;  %v3641_v48 = vpop.f32.mrf.mxu0 }
 0x199   :  { %4441 = vst [vmem:[#allocation71_spill] sm:$0xff] %v3639_v45  ;;  %v3643_v47 = vpop.f32.mrf.mxu1 }
 0x19a   :  { %4442 = vst [vmem:[#allocation72_spill] sm:$0xff] %v3641_v48 }
 0x19b   :  { %4443 = vst [vmem:[#allocation73_spill] sm:$0xff] %v3643_v47 }
 0x19f   :  { %v3645_v44 = vpop.f32.mrf.mxu2 }
 0x1a0   :  { %4444 = vst [vmem:[#allocation74_spill] sm:$0xff] %v3645_v44  ;;  %v3650_v42 = vpop.f32.mrf.mxu3  ;;  %v3652_v49 = vpop.f32.mrf.mxu0 }
 0x1a1   :  { %4445 = vst [vmem:[#allocation75_spill] sm:$0xff] %v3650_v42  ;;  %v3654_v46 = vpop.f32.mrf.mxu1 }
 0x1a2   :  { %4446 = vst [vmem:[#allocation76_spill] sm:$0xff] %v3652_v49  ;;  %v2601_v49 = vld [vmem:[%s4365_s2 + $0x38] sm:$0xff] }
 0x1a3   :  { %4447 = vst [vmem:[#allocation77_spill] sm:$0xff] %v3654_v46  ;;  %1293 = vmatmul.bf16.gmra.mxu0 %v2600_v39 }
 0x1a4   :  { %1347 = vmatmul.bf16.gmra.mxu1 %v2600_v39  ;;  %1401 = vmatmul.bf16.gmra.mxu2 %v2600_v39 }
 0x1a5   :  { %1455 = vmatmul.bf16.gmra.mxu3 %v2600_v39 }
 0x1a7   :  { %v3656_v40 = vpop.f32.mrf.mxu2 }
 0x1a8   :  { %4448 = vst [vmem:[#allocation78_spill] sm:$0xff] %v3656_v40  ;;  %v3658_v48 = vpop.f32.mrf.mxu3  ;;  %v3660_v47 = vpop.f32.mrf.mxu0 }
 0x1a9   :  { %4449 = vst [vmem:[#allocation79_spill] sm:$0xff] %v3658_v48  ;;  %v3662_v44 = vpop.f32.mrf.mxu1  ;;  %v802_v48 = vadd.f32 %v3519_v1, %v3156_v9  ;;  %v910_v9 = vadd.f32 %v3523_v8, %v3160_v11  ;;  %v964_v1 = vadd.f32 %v3525_v4, %v3162_v12  ;;  %v912_v12 = vadd.f32 %v3531_v34, %v3168_v15 }
 0x1aa   :  { %4450 = vst [vmem:[#allocation80_spill] sm:$0xff] %v3660_v47  ;;  %v861_v4 = vadd.f32 %v3540_v7, %v3177_v19  ;;  %v809_v19 = vadd.f32 %v3546_v52, %v3183_v22  ;;  %v971_v22 = vadd.f32 %v3555_v59, %v3192_v26  ;;  %v866_v52 = vadd.f32 %v3559_v56, %v3196_v28 }
 0x1ab   :  { %4451 = vst [vmem:[#allocation81_spill] sm:$0xff] %v3662_v44  ;;  %v920_v26 = vadd.f32 %v3561_v43, %v3198_v29  ;;  %v814_v28 = vadd.f32 %v3565_v54, %v3202_v31  ;;  %v976_v31 = vadd.f32 %v3574_v62, %v3211_v35  ;;  %v871_v54 = vadd.f32 %v3578_v53, %v3215_v37  ;;  %v4486_v62 = vld [vmem:[#allocation3_spill] sm:$0xff] }
 0x1ac   :  { %v925_v35 = vadd.f32 %v3580_v60, %v3217_v38  ;;  %v4493_v60 = vld [vmem:[#allocation5_spill] sm:$0xff] }
 0x1af   :  { %v3664_v45 = vpop.f32.mrf.mxu2 }
 0x1b0   :  { %4452 = vst [vmem:[#allocation82_spill] sm:$0xff] %v3664_v45  ;;  %v3669_v42 = vpop.f32.mrf.mxu3  ;;  %v3671_v46 = vpop.f32.mrf.mxu0 }
 0x1b1   :  { %4453 = vst [vmem:[#allocation83_spill] sm:$0xff] %v3669_v42  ;;  %v3673_v41 = vpop.f32.mrf.mxu1 }
 0x1b2   :  { %4454 = vst [vmem:[#allocation84_spill] sm:$0xff] %v3671_v46 }
 0x1b3   :  { %4455 = vst [vmem:[#allocation85_spill] sm:$0xff] %v3673_v41  ;;  %1298 = vmatmul.bf16.gmra.mxu0 %v2601_v49  ;;  %v2602_v41 = vld [vmem:[%s4365_s2 + $0x40] sm:$0xff] }
 0x1b4   :  { %1352 = vmatmul.bf16.gmra.mxu1 %v2601_v49  ;;  %1406 = vmatmul.bf16.gmra.mxu2 %v2601_v49 }
 0x1b5   :  { %1460 = vmatmul.bf16.gmra.mxu3 %v2601_v49  ;;  %v856_v49 = vadd.f32 %v3521_v5, %v3158_v10  ;;  %v804_v10 = vadd.f32 %v3527_v3, %v3164_v13  ;;  %v966_v13 = vadd.f32 %v3536_v16, %v3173_v17  ;;  %v915_v17 = vadd.f32 %v3542_v2, %v3179_v20 }
 0x1b7   :  { %v3675_v39 = vpop.f32.mrf.mxu2 }
 0x1b8   :  { %4456 = vst [vmem:[#allocation86_spill] sm:$0xff] %v3675_v39  ;;  %v3677_v47 = vpop.f32.mrf.mxu3  ;;  %v3679_v44 = vpop.f32.mrf.mxu0 }
 0x1b9   :  { %4457 = vst [vmem:[#allocation87_spill] sm:$0xff] %v3677_v47  ;;  %v3681_v45 = vpop.f32.mrf.mxu1 }
 0x1ba   :  { %4458 = vst [vmem:[#allocation88_spill] sm:$0xff] %v3679_v44 }
 0x1bf   :  { %v3685_v42 = vpop.f32.mrf.mxu2 }
 0x1c0   :  { %v3692_v46 = vpop.f32.mrf.mxu3  ;;  %v1264_v39 = vpop.f32.mrf.mxu0 }
 0x1c1   :  { %v3694_v47 = vadd.f32 %v1264_v39, %v802_v48  ;;  %v1318_v44 = vpop.f32.mrf.mxu1  ;;  %v858_v48 = vadd.f32 %v3529_v25, %v3166_v14  ;;  %v807_v14 = vadd.f32 %v3538_v61, %v3175_v18  ;;  %v969_v18 = vadd.f32 %v3544_v6, %v3181_v21 }
 0x1c2   :  { %v3696_v40 = vadd.f32 %v1318_v44, %v856_v49  ;;  %v863_v61 = vadd.f32 %v3548_v0, %v3185_v23  ;;  %v917_v21 = vadd.f32 %v3550_v63, %v3187_v24  ;;  %v812_v23 = vadd.f32 %v3557_v58, %v3194_v27 }
 0x1c3   :  { %4459 = vst [vmem:[#allocation89_spill] sm:$0xff] %v3694_v47  ;;  %1303 = vmatmul.bf16.gmra.mxu0 %v2602_v41  ;;  %v974_v27 = vadd.f32 %v3563_v55, %v3200_v30  ;;  %v868_v58 = vadd.f32 %v3567_v51, %v3204_v32  ;;  %v922_v30 = vadd.f32 %v3569_v50, %v3206_v33  ;;  %v4484_v50 = vld [vmem:[#allocation2_spill] sm:$0xff] }
 0x1c4   :  { %4460 = vst [vmem:[#allocation90_spill] sm:$0xff] %v3696_v40  ;;  %1357 = vmatmul.bf16.gmra.mxu1 %v2602_v41  ;;  %1411 = vmatmul.bf16.gmra.mxu2 %v2602_v41  ;;  %v817_v32 = vadd.f32 %v3576_v57, %v3213_v36  ;;  %v4485_v36 = vld [vmem:[#allocation47_spill] sm:$0xff] }
 0x1c5   :  { %1465 = vmatmul.bf16.gmra.mxu3 %v2602_v41  ;;  %v979_v57 = vadd.f32 %v4485_v36, %v4484_v50  ;;  %v4503_v50 = vld [vmem:[#allocation9_spill] sm:$0xff]  ;;  %v4504_v36 = vld [vmem:[#allocation54_spill] sm:$0xff] }
 0x1c7   :  { %v1372_v5 = vpop.f32.mrf.mxu2 }
 0x1c8   :  { %v3706_v39 = vadd.f32 %v1372_v5, %v910_v9  ;;  %v1426_v44 = vpop.f32.mrf.mxu3  ;;  %v1266_v49 = vpop.f32.mrf.mxu0 }
 0x1c9   :  { %v3708_v40 = vadd.f32 %v1426_v44, %v964_v1  ;;  %v3710_v41 = vadd.f32 %v1266_v49, %v804_v10  ;;  %v1320_v47 = vpop.f32.mrf.mxu1 }
 0x1ca   :  { %4461 = vst [vmem:[#allocation91_spill] sm:$0xff] %v3706_v39  ;;  %v3712_v11 = vadd.f32 %v1320_v47, %v858_v48 }
 0x1cb   :  { %4462 = vst [vmem:[#allocation92_spill] sm:$0xff] %v3708_v40  ;;  %v4524_v40 = vld [vmem:[#allocation57_spill] sm:$0xff] }
 0x1cc   :  { %4463 = vst [vmem:[#allocation93_spill] sm:$0xff] %v3710_v41 }
 0x1cd   :  { %4464 = vst [vmem:[#allocation94_spill] sm:$0xff] %v3712_v11 }
 0x1cf   :  { %v1374_v8 = vpop.f32.mrf.mxu2 }
 0x1d0   :  { %v3722_v3 = vadd.f32 %v1374_v8, %v912_v12  ;;  %v1428_v25 = vpop.f32.mrf.mxu3  ;;  %v1269_v9 = vpop.f32.mrf.mxu0 }
 0x1d1   :  { %v3724_v1 = vadd.f32 %v1428_v25, %v966_v13  ;;  %v3726_v47 = vadd.f32 %v1269_v9, %v807_v14  ;;  %v1323_v10 = vpop.f32.mrf.mxu1 }
 0x1d2   :  { %4465 = vst [vmem:[#allocation95_spill] sm:$0xff] %v3722_v3  ;;  %v3728_v15 = vadd.f32 %v1323_v10, %v861_v4 }
 0x1d3   :  { %4466 = vst [vmem:[#allocation96_spill] sm:$0xff] %v3724_v1 }
 0x1d4   :  { %4467 = vst [vmem:[#allocation97_spill] sm:$0xff] %v3726_v47  ;;  %v4554_v47 = vld [vmem:[#allocation74_spill] sm:$0xff] }
 0x1d5   :  { %4468 = vst [vmem:[#allocation98_spill] sm:$0xff] %v3728_v15  ;;  %v4553_v15 = vld [vmem:[#allocation29_spill] sm:$0xff] }
 0x1d6   :  { %v942_v41 = vadd.f32 %v4554_v47, %v4553_v15  ;;  %v4567_v15 = vld [vmem:[#allocation35_spill] sm:$0xff] }
 0x1d7   :  { %v1377_v7 = vpop.f32.mrf.mxu2 }
 0x1d8   :  { %v3738_v16 = vadd.f32 %v1377_v7, %v915_v17  ;;  %v1431_v34 = vpop.f32.mrf.mxu3  ;;  %v1271_v5 = vpop.f32.mrf.mxu0 }
 0x1d9   :  { %v3740_v48 = vadd.f32 %v1431_v34, %v969_v18  ;;  %v3742_v44 = vadd.f32 %v1271_v5, %v809_v19  ;;  %v1325_v49 = vpop.f32.mrf.mxu1  ;;  %v4488_v34 = vld [vmem:[#allocation4_spill] sm:$0xff]  ;;  %v4489_v5 = vld [vmem:[#allocation49_spill] sm:$0xff] }
 0x1da   :  { %4469 = vst [vmem:[#allocation99_spill] sm:$0xff] %v3738_v16  ;;  %v3744_v20 = vadd.f32 %v1325_v49, %v863_v61  ;;  %v4487_v61 = vld [vmem:[#allocation48_spill] sm:$0xff]  ;;  %v873_v49 = vadd.f32 %v4489_v5, %v4488_v34  ;;  %v4538_v16 = vld [vmem:[#allocation21_spill] sm:$0xff] }
 0x1db   :  { %4470 = vst [vmem:[#allocation100_spill] sm:$0xff] %v3740_v48  ;;  %v819_v37 = vadd.f32 %v4487_v61, %v4486_v62  ;;  %v4505_v62 = vld [vmem:[#allocation10_spill] sm:$0xff]  ;;  %v4506_v61 = vld [vmem:[#allocation55_spill] sm:$0xff] }
 0x1dc   :  { %4471 = vst [vmem:[#allocation101_spill] sm:$0xff] %v3742_v44  ;;  %v4526_v48 = vld [vmem:[#allocation58_spill] sm:$0xff]  ;;  %v4560_v44 = vld [vmem:[#allocation32_spill] sm:$0xff] }
 0x1dd   :  { %4472 = vst [vmem:[#allocation102_spill] sm:$0xff] %v3744_v20  ;;  %v4556_v20 = vld [vmem:[#allocation75_spill] sm:$0xff] }
 0x1df   :  { %v1379_v0 = vpop.f32.mrf.mxu2 }
 0x1e0   :  { %v3754_v6 = vadd.f32 %v1379_v0, %v917_v21  ;;  %v1433_v2 = vpop.f32.mrf.mxu3  ;;  %v1274_v12 = vpop.f32.mrf.mxu0 }
 0x1e1   :  { %v3756_v13 = vadd.f32 %v1433_v2, %v971_v22  ;;  %v3758_v14 = vadd.f32 %v1274_v12, %v812_v23  ;;  %v1328_v8 = vpop.f32.mrf.mxu1  ;;  %v4494_v12 = vld [vmem:[#allocation50_spill] sm:$0xff] }
 0x1e2   :  { %4473 = vst [vmem:[#allocation103_spill] sm:$0xff] %v3754_v6  ;;  %v3760_v24 = vadd.f32 %v1328_v8, %v866_v52  ;;  %v927_v8 = vadd.f32 %v4494_v12, %v4493_v60  ;;  %v4510_v60 = vld [vmem:[#allocation59_spill] sm:$0xff]  ;;  %v4541_v6 = vld [vmem:[#allocation68_spill] sm:$0xff] }
 0x1e3   :  { %4474 = vst [vmem:[#allocation104_spill] sm:$0xff] %v3756_v13 }
 0x1e4   :  { %4475 = vst [vmem:[#allocation105_spill] sm:$0xff] %v3758_v14 }
 0x1e5   :  { %4476 = vst [vmem:[#allocation106_spill] sm:$0xff] %v3760_v24 }
 0x1e7   :  { %v1382_v56 = vpop.f32.mrf.mxu2 }
 0x1e8   :  { %v3770_v59 = vadd.f32 %v1382_v56, %v920_v26  ;;  %v1436_v63 = vpop.f32.mrf.mxu3  ;;  %v1276_v4 = vpop.f32.mrf.mxu0  ;;  %v4495_v26 = vld [vmem:[#allocation6_spill] sm:$0xff]  ;;  %v4497_v56 = vld [vmem:[#allocation7_spill] sm:$0xff] }
 0x1e9   :  { %v3772_v25 = vadd.f32 %v1436_v63, %v974_v27  ;;  %v3774_v9 = vadd.f32 %v1276_v4, %v814_v28  ;;  %v1330_v10 = vpop.f32.mrf.mxu1  ;;  %v4496_v27 = vld [vmem:[#allocation51_spill] sm:$0xff] }
 0x1ea   :  { %4477 = vst [vmem:[#allocation107_spill] sm:$0xff] %v3770_v59  ;;  %v3776_v29 = vadd.f32 %v1330_v10, %v868_v58  ;;  %v981_v28 = vadd.f32 %v4496_v27, %v4495_v26  ;;  %v4498_v58 = vld [vmem:[#allocation52_spill] sm:$0xff]  ;;  %v4545_v59 = vld [vmem:[#allocation70_spill] sm:$0xff] }
 0x1eb   :  { %4478 = vst [vmem:[#allocation108_spill] sm:$0xff] %v3772_v25  ;;  %v822_v63 = vadd.f32 %v4498_v58, %v4497_v56  ;;  %v4499_v10 = vld [vmem:[#allocation8_spill] sm:$0xff]  ;;  %v4513_v58 = vld [vmem:[#allocation18_spill] sm:$0xff]  ;;  %v4528_v25 = vld [vmem:[#allocation15_spill] sm:$0xff] }
 0x1ec   :  { %4479 = vst [vmem:[#allocation109_spill] sm:$0xff] %v3776_v29  ;;  %v4571_v29 = vld [vmem:[#allocation37_spill] sm:$0xff] }
 0x1ef   :  { %v1384_v51 = vpop.f32.mrf.mxu2 }
 0x1f0   :  { %v3786_v55 = vadd.f32 %v1384_v51, %v922_v30  ;;  %v1438_v43 = vpop.f32.mrf.mxu3  ;;  %v1279_v17 = vpop.f32.mrf.mxu0  ;;  %v4500_v30 = vld [vmem:[#allocation53_spill] sm:$0xff] }
 0x1f1   :  { %v3788_v18 = vadd.f32 %v1438_v43, %v976_v31  ;;  %v3790_v19 = vadd.f32 %v1279_v17, %v817_v32  ;;  %v1333_v7 = vpop.f32.mrf.mxu1  ;;  %v876_v31 = vadd.f32 %v4500_v30, %v4499_v10 }
 0x1f2   :  { %4480 = vst [vmem:[#allocation110_spill] sm:$0xff] %v3786_v55  ;;  %v3792_v33 = vadd.f32 %v1333_v7, %v871_v54  ;;  %v4551_v55 = vld [vmem:[#allocation28_spill] sm:$0xff] }
 0x1f3   :  { %4481 = vst [vmem:[#allocation111_spill] sm:$0xff] %v3788_v18  ;;  %v4529_v18 = vld [vmem:[#allocation60_spill] sm:$0xff] }
 0x1f4   :  { %4482 = vst [vmem:[#allocation112_spill] sm:$0xff] %v3790_v19 }
 0x1f5   :  { %4483 = vst [vmem:[#allocation113_spill] sm:$0xff] %v3792_v33 }
 0x1f7   :  { %v1387_v53 = vpop.f32.mrf.mxu2 }
 0x1f8   :  { %v3802_v21 = vadd.f32 %v1387_v53, %v925_v35  ;;  %v1441_v22 = vpop.f32.mrf.mxu3  ;;  %v1281_v23 = vpop.f32.mrf.mxu0 }
 0x1f9   :  { %v3804_v0 = vadd.f32 %v1441_v22, %v979_v57  ;;  %v3806_v52 = vadd.f32 %v1281_v23, %v819_v37  ;;  %v1335_v2 = vpop.f32.mrf.mxu1  ;;  %v930_v57 = vadd.f32 %v4504_v36, %v4503_v50  ;;  %v984_v37 = vadd.f32 %v4506_v61, %v4505_v62  ;;  %v4517_v50 = vld [vmem:[#allocation67_spill] sm:$0xff] }
 0x1fa   :  { %4490 = vst [vmem:[#allocation2_spill] sm:$0xff] %v3802_v21  ;;  %v3808_v38 = vadd.f32 %v1335_v2, %v873_v49  ;;  %v4509_v2 = vld [vmem:[#allocation14_spill] sm:$0xff] }
 0x1fb   :  { %4491 = vst [vmem:[#allocation47_spill] sm:$0xff] %v3804_v0  ;;  %v986_v12 = vadd.f32 %v4510_v60, %v4509_v2  ;;  %v827_v0 = vadd.f32 %v4529_v18, %v4528_v25  ;;  %v1543_v18 = vld [vmem:[%s4366_s4] sm:$0xf] }
 0x1fc   :  { %4492 = vst [vmem:[#allocation3_spill] sm:$0xff] %v3808_v38  ;;  %v4555_v21 = vld [vmem:[#allocation30_spill] sm:$0xff]  ;;  %v3945_v14 = vperm.slane %v1543_v18, 3 }
 0x1fe   :  { %4573 = vst [vmem:[#allocation55_spill] sm:$0xff] %v3945_v14  ;;  %v4584_v14 = vld [vmem:[#allocation42_spill] sm:$0xff] }
 0x1ff   :  { %v1389_v4 = vpop.f32.mrf.mxu2 }
 0x200   :  { %v3818_v32 = vadd.f32 %v1389_v4, %v927_v8  ;;  %v1443_v51 = vpop.f32.mrf.mxu3  ;;  %v1284_v54 = vpop.f32.mrf.mxu0 }
 0x201   :  { %v3820_v43 = vadd.f32 %v1443_v51, %v981_v28  ;;  %v3822_v17 = vadd.f32 %v1284_v54, %v822_v63  ;;  %v1338_v7 = vpop.f32.mrf.mxu1  ;;  %v4514_v63 = vld [vmem:[#allocation63_spill] sm:$0xff] }
 0x202   :  { %4501 = vst [vmem:[#allocation48_spill] sm:$0xff] %v3818_v32  ;;  %v3824_v35 = vadd.f32 %v1338_v7, %v876_v31  ;;  %v989_v4 = vadd.f32 %v4514_v63, %v4513_v58  ;;  %v4516_v7 = vld [vmem:[#allocation22_spill] sm:$0xff]  ;;  %v4561_v32 = vld [vmem:[#allocation77_spill] sm:$0xff] }
 0x203   :  { %4502 = vst [vmem:[#allocation4_spill] sm:$0xff] %v3820_v43  ;;  %v991_v36 = vadd.f32 %v4517_v50, %v4516_v7  ;;  %v4523_v50 = vld [vmem:[#allocation12_spill] sm:$0xff] }
 0x204   :  { %v3876_v1 = vadd.f32 %v4524_v40, %v4523_v50  ;;  %v4530_v43 = vld [vmem:[#allocation16_spill] sm:$0xff]  ;;  %v4537_v50 = vld [vmem:[#allocation65_spill] sm:$0xff] }
 0x205   :  { %v4536_v40 = vld [vmem:[#allocation20_spill] sm:$0xff] }
 0x207   :  { %v1392_v53 = vpop.f32.mrf.mxu2 }
 0x208   :  { %v3830_v34 = vadd.f32 %v1392_v53, %v930_v57  ;;  %v1446_v5 = vpop.f32.mrf.mxu3  ;;  %v3832_v49 = vpop.f32.mrf.mxu0 }
 0x209   :  { %v3834_v22 = vadd.f32 %v1446_v5, %v984_v37  ;;  %v3836_v23 = vpop.f32.mrf.mxu1 }
 0x20a   :  { %4507 = vst [vmem:[#allocation49_spill] sm:$0xff] %v3830_v34  ;;  %v4569_v34 = vld [vmem:[#allocation36_spill] sm:$0xff] }
 0x20b   :  { %4508 = vst [vmem:[#allocation5_spill] sm:$0xff] %v3834_v22  ;;  %v4531_v22 = vld [vmem:[#allocation61_spill] sm:$0xff] }
 0x20f   :  { %v3840_v8 = vpop.f32.mrf.mxu2 }
 0x210   :  { %4511 = vst [vmem:[#allocation50_spill] sm:$0xff] %v3840_v8  ;;  %v1448_v26 = vpop.f32.mrf.mxu3  ;;  %v3842_v27 = vpop.f32.mrf.mxu0 }
 0x211   :  { %v3844_v28 = vadd.f32 %v1448_v26, %v986_v12  ;;  %v3846_v56 = vpop.f32.mrf.mxu1 }
 0x213   :  { %4512 = vst [vmem:[#allocation6_spill] sm:$0xff] %v3844_v28  ;;  %v881_v28 = vadd.f32 %v4531_v22, %v4530_v43  ;;  %v4542_v43 = vld [vmem:[#allocation24_spill] sm:$0xff]  ;;  %v4543_v22 = vld [vmem:[#allocation69_spill] sm:$0xff] }
 0x217   :  { %v3850_v10 = vpop.f32.mrf.mxu2 }
 0x218   :  { %v1451_v30 = vpop.f32.mrf.mxu3  ;;  %v3852_v31 = vpop.f32.mrf.mxu0 }
 0x219   :  { %v3854_v51 = vadd.f32 %v1451_v30, %v989_v4  ;;  %v3856_v54 = vpop.f32.mrf.mxu1  ;;  %v4521_v4 = vld [vmem:[#allocation11_spill] sm:$0xff]  ;;  %v4522_v30 = vld [vmem:[#allocation56_spill] sm:$0xff] }
 0x21a   :  { %v824_v7 = vadd.f32 %v4522_v30, %v4521_v4  ;;  %v4534_v4 = vld [vmem:[#allocation19_spill] sm:$0xff]  ;;  %v4535_v30 = vld [vmem:[#allocation64_spill] sm:$0xff] }
 0x21b   :  { %4515 = vst [vmem:[#allocation51_spill] sm:$0xff] %v3854_v51  ;;  %v4532_v51 = vld [vmem:[#allocation17_spill] sm:$0xff]  ;;  %v829_v3 = vadd.f32 %v4535_v30, %v4534_v4  ;;  %v4546_v30 = vld [vmem:[#allocation26_spill] sm:$0xff] }
 0x21f   :  { %v3860_v57 = vpop.f32.mrf.mxu2 }
 0x220   :  { %v1453_v62 = vpop.f32.mrf.mxu3  ;;  %v1294_v61 = vpop.f32.mrf.mxu0 }
 0x221   :  { %v3862_v37 = vadd.f32 %v1453_v62, %v991_v36  ;;  %v1348_v53 = vpop.f32.mrf.mxu1  ;;  %v4525_v62 = vld [vmem:[#allocation13_spill] sm:$0xff] }
 0x222   :  { %v3880_v13 = vadd.f32 %v4526_v48, %v4525_v62  ;;  %v4540_v62 = vld [vmem:[#allocation23_spill] sm:$0xff] }
 0x223   :  { %4518 = vst [vmem:[#allocation7_spill] sm:$0xff] %v3862_v37  ;;  %v4533_v37 = vld [vmem:[#allocation62_spill] sm:$0xff]  ;;  %v832_v25 = vadd.f32 %v4541_v6, %v4540_v62  ;;  %v4552_v6 = vld [vmem:[#allocation73_spill] sm:$0xff] }
 0x224   :  { %4527 = vst [vmem:[#allocation53_spill] sm:$0xff] %v3880_v13  ;;  %v3888_v39 = vadd.f32 %v4533_v37, %v4532_v51  ;;  %v886_v51 = vadd.f32 %v4543_v22, %v4542_v43  ;;  %v4544_v37 = vld [vmem:[#allocation25_spill] sm:$0xff]  ;;  %v888_v62 = vadd.f32 %v4552_v6, %v4551_v55  ;;  %v3921_v43 = vadd.f32 %v4556_v20, %v4555_v21  ;;  %v4558_v22 = vld [vmem:[#allocation31_spill] sm:$0xff]  ;;  %v4564_v55 = vld [vmem:[#allocation34_spill] sm:$0xff] }
 0x225   :  { %v3907_v4 = vadd.f32 %v4545_v59, %v4544_v37  ;;  %v4559_v59 = vld [vmem:[#allocation76_spill] sm:$0xff]  ;;  %v4565_v6 = vld [vmem:[#allocation79_spill] sm:$0xff]  ;;  %v4581_v13 = vld [vmem:[#allocation85_spill] sm:$0xff] }
 0x226   :  { %4557 = vst [vmem:[#allocation54_spill] sm:$0xff] %v3921_v43  ;;  %v837_v37 = vadd.f32 %v4559_v59, %v4558_v22  ;;  %v3935_v47 = vadd.f32 %v4565_v6, %v4564_v55  ;;  %v4568_v20 = vld [vmem:[#allocation80_spill] sm:$0xff]  ;;  %v3939_v43 = vperm.slane %v1543_v18, 2  ;;  %v4575_v6 = vld [vmem:[#allocation38_spill] sm:$0xff] }
 0x227   :  { %v3864_v5 = vpop.f32.mrf.mxu2  ;;  %v839_v21 = vadd.f32 %v4568_v20, %v4567_v15  ;;  %v4578_v15 = vld [vmem:[#allocation39_spill] sm:$0xff]  ;;  %v4579_v20 = vld [vmem:[#allocation84_spill] sm:$0xff] }
 0x228   :  { %v3866_v2 = vpop.f32.mrf.mxu3  ;;  %v1296_v60 = vpop.f32.mrf.mxu0  ;;  %4566 = vst [vmem:[#allocation10_spill] sm:$0xff] %v3935_v47  ;;  %v4576_v47 = vld [vmem:[#allocation83_spill] sm:$0xff] }
 0x229   :  { %4519 = vst [vmem:[#allocation52_spill] sm:$0xff] %v3866_v2  ;;  %v1350_v12 = vpop.f32.mrf.mxu1  ;;  %v883_v2 = vadd.f32 %v4537_v50, %v4536_v40  ;;  %v4547_v40 = vld [vmem:[#allocation71_spill] sm:$0xff]  ;;  %v3951_v38 = vadd.f32 %v4576_v47, %v4575_v6 }
 0x22a   :  { %v3911_v50 = vadd.f32 %v4547_v40, %v4546_v30  ;;  %v891_v30 = vadd.f32 %v4561_v32, %v4560_v44  ;;  %v4562_v40 = vld [vmem:[#allocation33_spill] sm:$0xff]  ;;  %v4585_v47 = vld [vmem:[#allocation87_spill] sm:$0xff] }
 0x22b   :  { %v4570_v44 = vld [vmem:[#allocation81_spill] sm:$0xff]  ;;  %4577 = vst [vmem:[#allocation59_spill] sm:$0xff] %v3951_v38  ;;  %v3967_v6 = vadd.f32 %v4585_v47, %v4584_v14  ;;  %v1519_v38 = vadd.f32 %v1294_v61, %v832_v25  ;;  %v1507_v25 = vadd.f32 %v3832_v49, %v824_v7 }
 0x22c   :  { %4548 = vst [vmem:[#allocation9_spill] sm:$0xff] %v3911_v50  ;;  %v4563_v50 = vld [vmem:[#allocation78_spill] sm:$0xff]  ;;  %v893_v32 = vadd.f32 %v4570_v44, %v4569_v34  ;;  %v4580_v44 = vld [vmem:[#allocation40_spill] sm:$0xff] }
 0x22d   :  { %v945_v24 = vadd.f32 %v4563_v50, %v4562_v40  ;;  %v4572_v50 = vld [vmem:[#allocation82_spill] sm:$0xff] }
 0x22e   :  { %v947_v40 = vadd.f32 %v4572_v50, %v4571_v29  ;;  %v3959_v29 = vadd.f32 %v4581_v13, %v4580_v44  ;;  %v1524_v50 = vadd.f32 %v1350_v12, %v888_v62  ;;  %v1520_v13 = vadd.f32 %v1348_v53, %v886_v51 }
 0x22f   :  { %v3868_v26 = vpop.f32.mrf.mxu2  ;;  %v1515_v12 = vadd.f32 %v3852_v31, %v829_v3  ;;  %v1516_v62 = vadd.f32 %v3856_v54, %v883_v2  ;;  %v1512_v53 = vadd.f32 %v3846_v56, %v881_v28  ;;  %v1521_v56 = vadd.f32 %v3864_v5, %v3907_v4 }
 0x230   :  { %v3870_v58 = vpop.f32.mrf.mxu3  ;;  %v1299_v63 = vpop.f32.mrf.mxu0  ;;  %v1525_v31 = vadd.f32 %v3868_v26, %v942_v41 }
 0x231   :  { %4520 = vst [vmem:[#allocation8_spill] sm:$0xff] %v3870_v58  ;;  %v1353_v36 = vpop.f32.mrf.mxu1  ;;  %v4539_v58 = vld [vmem:[#allocation66_spill] sm:$0xff]  ;;  %v1527_v22 = vadd.f32 %v1299_v63, %v837_v37  ;;  %v3955_v63 = vadd.f32 %v4579_v20, %v4578_v15 }
 0x232   :  { %v3896_v48 = vadd.f32 %v4539_v58, %v4538_v16  ;;  %v4549_v16 = vld [vmem:[#allocation27_spill] sm:$0xff]  ;;  %v4550_v58 = vld [vmem:[#allocation72_spill] sm:$0xff]  ;;  %v1528_v33 = vadd.f32 %v1353_v36, %v891_v30  ;;  %v4583_v36 = vld [vmem:[#allocation86_spill] sm:$0xff]  ;;  %v1607_v5 = vadd.f32 %v3939_v43, %v1525_v31 }
 0x233   :  { %v834_v11 = vadd.f32 %v4550_v58, %v4549_v16  ;;  %v3929_v16 = vperm.slane %v1543_v18, 0  ;;  %v3931_v58 = vperm.slane %v1543_v18, 1  ;;  %v4582_v18 = vld [vmem:[#allocation41_spill] sm:$0xff] }
 0x234   :  { %v3963_v30 = vadd.f32 %v4583_v36, %v4582_v18  ;;  %v1517_v18 = vadd.f32 %v3860_v57, %v3896_v48  ;;  %v1603_v48 = vadd.f32 %v3939_v43, %v1521_v56  ;;  %v4595_v31 = vld [vmem:[#allocation113_spill] sm:$0xff] }
 0x235   :  { %v1523_v37 = vadd.f32 %v1296_v60, %v834_v11  ;;  %v1609_v15 = vadd.f32 %v3929_v16, %v1527_v22  ;;  %v4586_v60 = vld [vmem:[#allocation43_spill] sm:$0xff]  ;;  %v1610_v20 = vadd.f32 %v3931_v58, %v1528_v33  ;;  %v1601_v33 = vadd.f32 %v3929_v16, %v1519_v38  ;;  %v4596_v56 = vld [vmem:[#allocation89_spill] sm:$0xff] }
 0x236   :  { %v1602_v3 = vadd.f32 %v3931_v58, %v1520_v13 }
 0x237   :  { %v1407_v59 = vpop.f32.mrf.mxu2  ;;  %v1605_v14 = vadd.f32 %v3929_v16, %v1523_v37  ;;  %v1682_v54 = vmax.f32 %v1610_v20, 0.0  ;;  %v1673_v37 = vmax.f32 %v1601_v33, 0.0  ;;  %v1586_v20 = vadd.f32 %v3931_v58, %v3824_v35 }
 0x238   :  { %v3947_v19 = vpop.f32.mrf.mxu3  ;;  %v1301_v55 = vpop.f32.mrf.mxu0  ;;  %v1529_v22 = vadd.f32 %v1407_v59, %v945_v24  ;;  %v1508_v24 = vadd.f32 %v3836_v23, %v3876_v1  ;;  %v4588_v59 = vld [vmem:[#allocation44_spill] sm:$0xff]  ;;  %v1594_v23 = vadd.f32 %v3931_v58, %v1512_v53  ;;  %v1674_v36 = vmax.f32 %v1602_v3, 0.0  ;;  %v4593_v53 = vld [vmem:[#allocation3_spill] sm:$0xff] }
 0x239   :  { %4574 = vst [vmem:[#allocation14_spill] sm:$0xff] %v3947_v19  ;;  %v1531_v8 = vadd.f32 %v1301_v55, %v839_v21  ;;  %v1355_v34 = vpop.f32.mrf.mxu1  ;;  %v4587_v21 = vld [vmem:[#allocation88_spill] sm:$0xff]  ;;  %v1677_v38 = vmax.f32 %v1605_v14, 0.0  ;;  %v1679_v14 = vmax.f32 %v1607_v5, 0.0  ;;  %v1581_v35 = vadd.f32 %v3929_v16, %v3806_v52 }
 0x23a   :  { %v1532_v19 = vadd.f32 %v1355_v34, %v893_v32  ;;  %v3973_v55 = vadd.f32 %v4587_v21, %v4586_v60  ;;  %v1511_v34 = vadd.f32 %v3842_v27, %v827_v0  ;;  %v1597_v0 = vadd.f32 %v3929_v16, %v1515_v12  ;;  %v4594_v3 = vld [vmem:[#allocation112_spill] sm:$0xff] }
 0x23b   :  { %v1613_v11 = vadd.f32 %v3929_v16, %v1531_v8  ;;  %v1606_v8 = vadd.f32 %v3931_v58, %v1524_v50  ;;  %v1598_v27 = vadd.f32 %v3931_v58, %v1516_v62  ;;  %v1611_v41 = vadd.f32 %v3939_v43, %v1529_v22  ;;  %v4589_v50 = vld [vmem:[#allocation45_spill] sm:$0xff]  ;;  %v4592_v22 = vld [vmem:[#allocation50_spill] sm:$0xff] }
 0x23c   :  { %v1614_v44 = vadd.f32 %v3931_v58, %v1532_v19  ;;  %v1681_v19 = vmax.f32 %v1609_v15, 0.0  ;;  %v1593_v1 = vadd.f32 %v3929_v16, %v1511_v34  ;;  %v4006_v47 = vadd.f32 %v3685_v42, %v4589_v50  ;;  %v4590_v15 = vld [vmem:[#allocation46_spill] sm:$0xff]  ;;  %v4600_v50 = vld [vmem:[#allocation49_spill] sm:$0xff] }
 0x23d   :  { %v1685_v61 = vmax.f32 %v1613_v11, 0.0  ;;  %v1678_v7 = vmax.f32 %v1606_v8, 0.0  ;;  %v1589_v11 = vadd.f32 %v3929_v16, %v1507_v25  ;;  %v1669_v60 = vmax.f32 %v1597_v0, 0.0 }
 0x23e   :  { %v1686_v32 = vmax.f32 %v1614_v44, 0.0  ;;  %v1590_v21 = vadd.f32 %v3931_v58, %v1508_v24  ;;  %v1670_v57 = vmax.f32 %v1598_v27, 0.0  ;;  %v1683_v13 = vmax.f32 %v1611_v41, 0.0  ;;  %v4597_v41 = vld [vmem:[#allocation90_spill] sm:$0xff] }
 0x23f   :  { %v1409_v51 = vpop.f32.mrf.mxu2  ;;  %1703 = vmatpush.msrb.mxu1 %v1685_v61  ;;  %v1585_v42 = vadd.f32 %v3929_v16, %v3822_v17  ;;  %v1513_v44 = vadd.f32 %v3850_v10, %v3888_v39  ;;  %v1666_v12 = vmax.f32 %v1594_v23, 0.0  ;;  %v1599_v62 = vadd.f32 %v3939_v43, %v1517_v18  ;;  %v4591_v10 = vld [vmem:[#allocation53_spill] sm:$0xff] }
 0x240   :  { %v1533_v2 = vadd.f32 %v1409_v51, %v947_v40  ;;  %v3987_v49 = vpop.f32.mrf.mxu3  ;;  %1743 = vmatpush.msrb.mxu2 %v1686_v32  ;;  %v898_v40 = vadd.f32 %v3681_v45, %v4588_v59  ;;  %v4010_v45 = vadd.f32 %v3692_v46, %v4590_v15  ;;  %v1665_v46 = vmax.f32 %v1593_v1, 0.0  ;;  %v4022_v61 = vpop.f32.mrf.mxu0  ;;  %v4598_v1 = vld [vmem:[#allocation105_spill] sm:$0xff] }
 0x241   :  { %v1358_v28 = vpop.f32.mrf.mxu1  ;;  %1704 = vmatpush.msrb.mxu1 %v1681_v19  ;;  %v4027_v17 = vadd.f32 %v3929_v16, %v3774_v9  ;;  %v1661_v39 = vmax.f32 %v1589_v11, 0.0  ;;  %v1509_v32 = vadd.f32 %v4592_v22, %v4591_v10  ;;  %v1582_v33 = vadd.f32 %v3931_v58, %v4593_v53 }
 0x242   :  { %v1615_v26 = vadd.f32 %v3939_v43, %v1533_v2  ;;  %1744 = vmatpush.msrb.mxu2 %v1682_v54  ;;  %v1536_v25 = vadd.f32 %v1358_v28, %v3959_v29  ;;  %v1662_v29 = vmax.f32 %v1590_v21, 0.0  ;;  %v1675_v19 = vmax.f32 %v1603_v48, 0.0  ;;  %v4601_v21 = vld [vmem:[#allocation106_spill] sm:$0xff] }
 0x243   :  { %1705 = vmatpush.msrb.mxu1 %v1677_v38  ;;  %v1577_v9 = vadd.f32 %v3929_v16, %v4594_v3  ;;  %v1578_v52 = vadd.f32 %v3931_v58, %v4595_v31  ;;  %v1657_v54 = vmax.f32 %v1585_v42, 0.0  ;;  %v1595_v2 = vadd.f32 %v3939_v43, %v1513_v44 }
 0x244   :  { %v1687_v4 = vmax.f32 %v1615_v26, 0.0  ;;  %1745 = vmatpush.msrb.mxu2 %v1678_v7  ;;  %v1658_v0 = vmax.f32 %v1586_v20, 0.0  ;;  %v1671_v27 = vmax.f32 %v1599_v62, 0.0  ;;  %v1618_v38 = vadd.f32 %v3931_v58, %v1536_v25 }
 0x245   :  { %1706 = vmatpush.msrb.mxu1 %v1673_v37  ;;  %v4046_v7 = vadd.f32 %v3929_v16, %v4596_v56  ;;  %v4050_v26 = vadd.f32 %v3931_v58, %v4597_v41  ;;  %v1653_v59 = vmax.f32 %v1581_v35, 0.0  ;;  %v1569_v23 = vadd.f32 %v3929_v16, %v4598_v1  ;;  %v4599_v37 = vld [vmem:[#allocation109_spill] sm:$0xff]  ;;  %v4611_v56 = vld [vmem:[#allocation94_spill] sm:$0xff]  ;;  %v4612_v1 = vld [vmem:[#allocation59_spill] sm:$0xff] }
 0x246   :  { %1746 = vmatpush.msrb.mxu2 %v1674_v36  ;;  %1783 = vmatpush.msrb.mxu0 %v1687_v4  ;;  %v1574_v18 = vadd.f32 %v3931_v58, %v4599_v37  ;;  %v1654_v36 = vmax.f32 %v1582_v33, 0.0  ;;  %v1649_v4 = vmax.f32 %v1577_v9, 0.0  ;;  %v1587_v15 = vadd.f32 %v3939_v43, %v4600_v50  ;;  %v4609_v9 = vld [vmem:[#allocation98_spill] sm:$0xff]  ;;  %v4613_v37 = vld [vmem:[#allocation107_spill] sm:$0xff] }
 0x247   :  { %1707 = vmatpush.msrb.mxu1 %v1669_v60  ;;  %v4040_v24 = vpop.f32.mrf.mxu2  ;;  %v1667_v11 = vmax.f32 %v1595_v2, 0.0  ;;  %v1645_v48 = vmax.f32 %v4027_v17, 0.0  ;;  %v1690_v42 = vmax.f32 %v1618_v38, 0.0  ;;  %v1641_v35 = vmax.f32 %v1569_v23, 0.0 }
 0x248   :  { %v1466_v8 = vpop.f32.mrf.mxu3  ;;  %1747 = vmatpush.msrb.mxu2 %v1670_v57  ;;  %1784 = vmatpush.msrb.mxu0 %v1683_v13  ;;  %v1570_v57 = vadd.f32 %v3931_v58, %v4601_v21  ;;  %v1650_v13 = vmax.f32 %v1578_v52, 0.0  ;;  %v1306_v10 = vpop.f32.mrf.mxu0  ;;  %v1562_v31 = vadd.f32 %v3931_v58, %v4609_v9  ;;  %v1558_v41 = vadd.f32 %v3931_v58, %v4611_v56  ;;  %v4616_v21 = vld [vmem:[#allocation103_spill] sm:$0xff] }
 0x249   :  { %v1360_v34 = vpop.f32.mrf.mxu1  ;;  %1708 = vmatpush.msrb.mxu1 %v1665_v46  ;;  %v1538_v60 = vadd.f32 %v1466_v8, %v3967_v6  ;;  %v4602_v46 = vld [vmem:[#allocation48_spill] sm:$0xff]  ;;  %v4069_v6 = vld [vmem:[%s4367_s5 + $0x8] sm:$0xff]  ;;  %v4604_v8 = vld [vmem:[#allocation102_spill] sm:$0xff]  ;;  %v1534_v23 = vadd.f32 %v3987_v49, %v4612_v1 }
 0x24a   :  { %v1540_v51 = vadd.f32 %v1360_v34, %v898_v40  ;;  %1748 = vmatpush.msrb.mxu2 %v1666_v12  ;;  %1785 = vmatpush.msrb.mxu0 %v1679_v14  ;;  %v1591_v40 = vadd.f32 %v3939_v43, %v1509_v32  ;;  %v1583_v44 = vadd.f32 %v3939_v43, %v4602_v46  ;;  %v4603_v14 = vld [vmem:[#allocation101_spill] sm:$0xff]  ;;  %v1659_v32 = vmax.f32 %v1587_v15, 0.0  ;;  %v4606_v34 = vld [vmem:[#allocation55_spill] sm:$0xff]  ;;  %v4614_v15 = vld [vmem:[#allocation10_spill] sm:$0xff] }
 0x24b   :  { %1709 = vmatpush.msrb.mxu1 %v1661_v39  ;;  %v1565_v25 = vadd.f32 %v3929_v16, %v4603_v14  ;;  %v1566_v17 = vadd.f32 %v3931_v58, %v4604_v8  ;;  %v1646_v39 = vmax.f32 %v1574_v18, 0.0  ;;  %v1620_v53 = vadd.f32 %v4606_v34, %v1538_v60  ;;  %v4626_v1 = vld [vmem:[#allocation6_spill] sm:$0xff] }
 0x24c   :  { %v1622_v28 = vadd.f32 %v3931_v58, %v1540_v51  ;;  %1749 = vmatpush.msrb.mxu2 %v1662_v29  ;;  %1786 = vmatpush.msrb.mxu0 %v1675_v19  ;;  %v1663_v12 = vmax.f32 %v1591_v40, 0.0  ;;  %v4607_v29 = vld [vmem:[#allocation93_spill] sm:$0xff]  ;;  %v1642_v52 = vmax.f32 %v1570_v57, 0.0  ;;  %v1571_v18 = vadd.f32 %v3939_v43, %v4613_v37  ;;  %v4615_v58 = vld [vmem:[#allocation14_spill] sm:$0xff] }
 0x24d   :  { %1710 = vmatpush.msrb.mxu1 %v1657_v54  ;;  %v1557_v19 = vadd.f32 %v3929_v16, %v4607_v29  ;;  %v4608_v51 = vld [vmem:[#allocation97_spill] sm:$0xff]  ;;  %v4610_v54 = vld [vmem:[#allocation110_spill] sm:$0xff]  ;;  %v1638_v40 = vmax.f32 %v1566_v17, 0.0  ;;  %v1634_v50 = vmax.f32 %v1562_v31, 0.0  ;;  %v1567_v57 = vadd.f32 %v3939_v43, %v4616_v21 }
 0x24e   :  { %v1694_v5 = vmax.f32 %v1622_v28, 0.0  ;;  %1750 = vmatpush.msrb.mxu2 %v1658_v0  ;;  %1787 = vmatpush.msrb.mxu0 %v1671_v27  ;;  %v1561_v3 = vadd.f32 %v3929_v16, %v4608_v51  ;;  %v1575_v2 = vadd.f32 %v3939_v43, %v4610_v54  ;;  %v1655_v0 = vmax.f32 %v1583_v44, 0.0  ;;  %v4620_v17 = vld [vmem:[#allocation9_spill] sm:$0xff]  ;;  %v4624_v54 = vld [vmem:[#allocation7_spill] sm:$0xff] }
 0x24f   :  { %1711 = vmatpush.msrb.mxu1 %v1653_v59  ;;  %v1539_v27 = vadd.f32 %v1306_v10, %v3973_v55  ;;  %v1414_v38 = vpop.f32.mrf.mxu2  ;;  %v1637_v59 = vmax.f32 %v1565_v25, 0.0  ;;  %v1535_v55 = vadd.f32 %v4022_v61, %v3955_v63  ;;  %v1629_v49 = vmax.f32 %v1557_v19, 0.0  ;;  %v4617_v61 = vld [vmem:[#allocation54_spill] sm:$0xff] }
 0x250   :  { %v1468_v20 = vpop.f32.mrf.mxu3  ;;  %1751 = vmatpush.msrb.mxu2 %v1654_v36  ;;  %1777 = vmatpush.msrb.mxu3 %v1694_v5  ;;  %v1692_v5 = vmax.f32 %v1620_v53, 0.0  ;;  %v1541_v60 = vadd.f32 %v1414_v38, %v4006_v47  ;;  %v1630_v63 = vmax.f32 %v1558_v41, 0.0  ;;  %v1616_v46 = vadd.f32 %v4606_v34, %v1534_v23 }
 0x251   :  { %v1542_v62 = vadd.f32 %v1468_v20, %v4010_v45  ;;  %1788 = vmatpush.msrb.mxu0 %v1667_v11  ;;  %1712 = vmatpush.msrb.mxu1 %v1649_v4  ;;  %v4605_v45 = vld [vmem:[#allocation2_spill] sm:$0xff]  ;;  %v1633_v4 = vmax.f32 %v1561_v3, 0.0  ;;  %v1530_v11 = vadd.f32 %v4615_v58, %v4614_v15  ;;  %v1537_v47 = vadd.f32 %v4040_v24, %v3963_v30  ;;  %v4622_v24 = vld [vmem:[#allocation95_spill] sm:$0xff]  ;;  %v1877_v15 = vld [vmem:[%s4368_s6 + $0x70] sm:$0xff] }
 0x252   :  { %1752 = vmatpush.msrb.mxu2 %v1650_v13  ;;  %1778 = vmatpush.msrb.mxu3 %v1690_v42  ;;  %v1579_v22 = vadd.f32 %v3939_v43, %v4605_v45  ;;  %v1621_v13 = vadd.f32 %v3929_v16, %v1539_v27  ;;  %v4618_v42 = vld [vmem:[#allocation8_spill] sm:$0xff]  ;;  %v1625_v44 = vmax.f32 %v4046_v7, 0.0  ;;  %v1643_v14 = vmax.f32 %v1571_v18, 0.0  ;;  %v1878_v18 = vld [vmem:[%s4368_s6 + $0x78] sm:$0xff]  ;;  %v1891_v58 = vld [vmem:[%s4368_s6 + $0xe0] sm:$0xff] }
 0x253   :  { %v1624_v33 = vadd.f32 %v4606_v34, %v1542_v62  ;;  %1789 = vmatpush.msrb.mxu0 %v1663_v12  ;;  %1713 = vmatpush.msrb.mxu1 %v1645_v48  ;;  %v1647_v48 = vmax.f32 %v1575_v2, 0.0  ;;  %v1526_v20 = vadd.f32 %v4618_v42, %v4617_v61  ;;  %v4619_v12 = vld [vmem:[#allocation99_spill] sm:$0xff]  ;;  %v1617_v25 = vadd.f32 %v3929_v16, %v1535_v55  ;;  %v4123_v16 = vld [vmem:[%s4367_s5] sm:$0xff]  ;;  %v1909_v55 = vld [vmem:[%s4368_s6 + $0x170] sm:$0xff] }
 0x254   :  { %1753 = vmatpush.msrb.mxu2 %v1646_v39  ;;  %2573 = vmatmul.msk.f32.vlgmr.msrb.gmra.mxu3 %vm1699_vm0, %v4069_v6  ;;  %v1651_v36 = vmax.f32 %v1579_v22, 0.0  ;;  %v1563_v62 = vadd.f32 %v3939_v43, %v4619_v12  ;;  %v1626_v8 = vmax.f32 %v4050_v26, 0.0  ;;  %v1612_v10 = vadd.f32 %v4606_v34, %v1530_v11  ;;  %v1908_v11 = vld [vmem:[%s4368_s6 + $0x168] sm:$0xff] }
 0x255   :  { %v1696_v28 = vmax.f32 %v1624_v33, 0.0  ;;  %1790 = vmatpush.msrb.mxu0 %v1659_v32  ;;  %1714 = vmatpush.msrb.mxu1 %v1641_v35  ;;  %v4621_v35 = vld [vmem:[#allocation52_spill] sm:$0xff]  ;;  %v1623_v30 = vadd.f32 %v3939_v43, %v1541_v60  ;;  %v1559_v7 = vadd.f32 %v3939_v43, %v4622_v24  ;;  %v1639_v45 = vmax.f32 %v1567_v57, 0.0  ;;  %v4623_v33 = vld [vmem:[#allocation91_spill] sm:$0xff] }
 0x256   :  { %1754 = vmatpush.msrb.mxu2 %v1642_v52  ;;  %v1522_v39 = vadd.f32 %v4621_v35, %v4620_v17  ;;  %v1693_v22 = vmax.f32 %v1621_v13, 0.0  ;;  %v1608_v26 = vadd.f32 %v4606_v34, %v1526_v20  ;;  %v1688_v32 = vmax.f32 %v1616_v46, 0.0  ;;  %v4628_v60 = vld [vmem:[#allocation4_spill] sm:$0xff]  ;;  %v1876_v57 = vld [vmem:[%s4368_s6 + $0x68] sm:$0xff]  ;;  %v1907_v13 = vld [vmem:[%s4368_s6 + $0x160] sm:$0xff] }
 0x257   :  { %1791 = vmatpush.msrb.mxu0 %v1655_v0  ;;  %1857 = vmatpush.msra.mxu3 %v1696_v28  ;;  %v1619_v53 = vadd.f32 %v3939_v43, %v1537_v47  ;;  %v1555_v29 = vadd.f32 %v3939_v43, %v4623_v33  ;;  %v1635_v19 = vmax.f32 %v1563_v62, 0.0  ;;  %v1689_v51 = vmax.f32 %v1617_v25, 0.0  ;;  %v1894_v43 = vld [vmem:[%s4368_s6 + $0xf8] sm:$0xff]  ;;  %v4625_v28 = vld [vmem:[#allocation51_spill] sm:$0xff]  ;;  %v1875_v20 = vld [vmem:[%s4368_s6 + $0x60] sm:$0xff] }
 0x258   :  { %1715 = vmatpush.msrb.mxu1 %v1637_v59  ;;  %1755 = vmatpush.msrb.mxu2 %v1638_v40  ;;  %v1604_v3 = vadd.f32 %v4606_v34, %v1522_v39  ;;  %v1684_v9 = vmax.f32 %v1612_v10, 0.0  ;;  %v1695_v31 = vmax.f32 %v1623_v30, 0.0  ;;  %v1631_v52 = vmax.f32 %v1559_v7, 0.0  ;;  %v1893_v59 = vld [vmem:[%s4368_s6 + $0xf0] sm:$0xff]  ;;  %v1910_v40 = vld [vmem:[%s4368_s6 + $0x178] sm:$0xff]  ;;  %v4630_v47 = vld [vmem:[#allocation111_spill] sm:$0xff] }
 0x259   :  { %1792 = vmatpush.msrb.mxu0 %v1651_v36  ;;  %1858 = vmatpush.msra.mxu3 %v1692_v5  ;;  %v1600_v2 = vadd.f32 %v4606_v34, %v4624_v54  ;;  %v1680_v0 = vmax.f32 %v1608_v26, 0.0  ;;  %v1691_v27 = vmax.f32 %v1619_v53, 0.0  ;;  %v1627_v38 = vmax.f32 %v1555_v29, 0.0  ;;  %v1892_v36 = vld [vmem:[%s4368_s6 + $0xe8] sm:$0xff]  ;;  %v4627_v5 = vld [vmem:[#allocation5_spill] sm:$0xff]  ;;  %v1889_v46 = vld [vmem:[%s4368_s6 + $0xd0] sm:$0xff] }
 0x25a   :  { %1716 = vmatpush.msrb.mxu1 %v1633_v4  ;;  %1756 = vmatpush.msrb.mxu2 %v1634_v50  ;;  %v1596_v56 = vadd.f32 %v4606_v34, %v4625_v28  ;;  %v1676_v41 = vmax.f32 %v1604_v3, 0.0  ;;  %v1592_v23 = vadd.f32 %v4606_v34, %v4626_v1  ;;  %v1588_v4 = vadd.f32 %v4606_v34, %v4627_v5  ;;  %v1874_v62 = vld [vmem:[%s4368_s6 + $0x58] sm:$0xff]  ;;  %v1873_v39 = vld [vmem:[%s4368_s6 + $0x50] sm:$0xff]  ;;  %v1887_v10 = vld [vmem:[%s4368_s6 + $0xc0] sm:$0xff] }
 0x25b   :  { %1793 = vmatpush.msrb.mxu0 %v1647_v48  ;;  %1951 = vmatpush.msrb.mxu3 %v1894_v43  ;;  %v1672_v37 = vmax.f32 %v1600_v2, 0.0  ;;  %v1890_v48 = vld [vmem:[%s4368_s6 + $0xd8] sm:$0xff]  ;;  %v1905_v30 = vld [vmem:[%s4368_s6 + $0x150] sm:$0xff]  ;;  %v1871_v33 = vld [vmem:[%s4368_s6 + $0x40] sm:$0xff] }
 0x25c   :  { %1717 = vmatpush.msrb.mxu1 %v1629_v49  ;;  %1757 = vmatpush.msrb.mxu2 %v1630_v63  ;;  %v1668_v50 = vmax.f32 %v1596_v56, 0.0  ;;  %v1584_v49 = vadd.f32 %v4606_v34, %v4628_v60  ;;  %v1664_v21 = vmax.f32 %v1592_v23, 0.0  ;;  %v4629_v63 = vld [vmem:[#allocation47_spill] sm:$0xff]  ;;  %v1660_v42 = vmax.f32 %v1588_v4, 0.0  ;;  %v1906_v25 = vld [vmem:[%s4368_s6 + $0x158] sm:$0xff]  ;;  %v4632_v24 = vld [vmem:[#allocation104_spill] sm:$0xff] }
 0x25d   :  { %1794 = vmatpush.msrb.mxu0 %v1643_v14  ;;  %2575 = vmatmul.msk.f32.vlgmr.msra.gmra.mxu3 %vm1699_vm0, %v4069_v6  ;;  %v1580_v61 = vadd.f32 %v4606_v34, %v4629_v63  ;;  %v1888_v14 = vld [vmem:[%s4368_s6 + $0xc8] sm:$0xff]  ;;  %v1568_v7 = vadd.f32 %v4606_v34, %v4632_v24  ;;  %v4633_v26 = vld [vmem:[#allocation100_spill] sm:$0xff]  ;;  %v1923_v43 = vld [vmem:[%s4368_s6 + $0x1e0] sm:$0xff] }
 0x25e   :  { %1718 = vmatpush.msrb.mxu1 %v1625_v44  ;;  %1758 = vmatpush.msrb.mxu2 %v1626_v8  ;;  %v1576_v44 = vadd.f32 %v4606_v34, %v4630_v47  ;;  %v1656_v12 = vmax.f32 %v1584_v49, 0.0  ;;  %v4631_v8 = vld [vmem:[#allocation108_spill] sm:$0xff]  ;;  %v1920_v28 = vld [vmem:[%s4368_s6 + $0x1c8] sm:$0xff]  ;;  %v1919_v56 = vld [vmem:[%s4368_s6 + $0x1c0] sm:$0xff] }
 0x25f   :  { %1795 = vmatpush.msrb.mxu0 %v1639_v45  ;;  %1719 = vmatmul.f32.vlgmr.msrb.gmra.mxu1 %v4123_v16  ;;  %v1572_v17 = vadd.f32 %v4606_v34, %v4631_v8  ;;  %v1652_v35 = vmax.f32 %v1580_v61, 0.0  ;;  %v1885_v29 = vld [vmem:[%s4368_s6 + $0xb0] sm:$0xff]  ;;  %v1640_v3 = vmax.f32 %v1568_v7, 0.0  ;;  %v1918_v1 = vld [vmem:[%s4368_s6 + $0x1b8] sm:$0xff]  ;;  %v1915_v60 = vld [vmem:[%s4368_s6 + $0x1a0] sm:$0xff] }
 0x260   :  { %1737 = vmatpush.msra.mxu1 %v1693_v22  ;;  %1823 = vmatpush.msra.mxu2 %v1688_v32  ;;  %v1648_v45 = vmax.f32 %v1576_v44, 0.0  ;;  %v1886_v22 = vld [vmem:[%s4368_s6 + $0xb8] sm:$0xff]  ;;  %v1564_v32 = vadd.f32 %v4606_v34, %v4633_v26  ;;  %v1869_v23 = vld [vmem:[%s4368_s6 + $0x30] sm:$0xff]  ;;  %v1879_v63 = vld [vmem:[%s4368_s6 + $0x80] sm:$0xff] }
 0x261   :  { %1796 = vmatpush.msrb.mxu0 %v1635_v19  ;;  %1759 = vmatmul.f32.vlgmr.msrb.gmra.mxu2 %v4123_v16  ;;  %v1644_v53 = vmax.f32 %v1572_v17, 0.0  ;;  %v4634_v19 = vld [vmem:[#allocation96_spill] sm:$0xff]  ;;  %v1882_v5 = vld [vmem:[%s4368_s6 + $0x98] sm:$0xff]  ;;  %v1899_v61 = vld [vmem:[%s4368_s6 + $0x120] sm:$0xff] }
 0x262   :  { %1738 = vmatpush.msra.mxu1 %v1689_v51  ;;  %1824 = vmatpush.msra.mxu2 %v1684_v9  ;;  %v1560_v51 = vadd.f32 %v4606_v34, %v4634_v19  ;;  %v4635_v9 = vld [vmem:[#allocation92_spill] sm:$0xff]  ;;  %v1902_v4 = vld [vmem:[%s4368_s6 + $0x138] sm:$0xff]  ;;  %v1863_v47 = vld [vmem:[%s4368_s6] sm:$0xff] }
 0x263   :  { %1797 = vmatpush.msrb.mxu0 %v1631_v52  ;;  %1952 = vmatpush.msrb.mxu3 %v1893_v59  ;;  %v1636_v52 = vmax.f32 %v1564_v32, 0.0  ;;  %v1884_v59 = vld [vmem:[%s4368_s6 + $0xa8] sm:$0xff]  ;;  %v1866_v49 = vld [vmem:[%s4368_s6 + $0x18] sm:$0xff]  ;;  %v1897_v44 = vld [vmem:[%s4368_s6 + $0x110] sm:$0xff] }
 0x264   :  { %1817 = vmatpush.msrb.mxu1 %v1695_v31  ;;  %1825 = vmatpush.msra.mxu2 %v1680_v0  ;;  %v1556_v31 = vadd.f32 %v4606_v34, %v4635_v9  ;;  %v1632_v54 = vmax.f32 %v1560_v51, 0.0  ;;  %v1926_v0 = vld [vmem:[%s4368_s6 + $0x1f8] sm:$0xff]  ;;  %v1924_v34 = vld [vmem:[%s4368_s6 + $0x1e8] sm:$0xff]  ;;  %v1911_v8 = vld [vmem:[%s4368_s6 + $0x180] sm:$0xff] }
 0x265   :  { %1798 = vmatpush.msrb.mxu0 %v1627_v38  ;;  %1953 = vmatpush.msrb.mxu3 %v1892_v36  ;;  %v1922_v38 = vld [vmem:[%s4368_s6 + $0x1d8] sm:$0xff]  ;;  %v1917_v36 = vld [vmem:[%s4368_s6 + $0x1b0] sm:$0xff]  ;;  %v2699_v32 = vld [vmem:[%s4369_s7] ss:$0 sm:$0xff] }
 0x266   :  { %1818 = vmatpush.msrb.mxu1 %v1691_v27  ;;  %1826 = vmatpush.msra.mxu2 %v1676_v41  ;;  %v1628_v2 = vmax.f32 %v1556_v31, 0.0  ;;  %v1925_v27 = vld [vmem:[%s4368_s6 + $0x1f0] sm:$0xff]  ;;  %v1870_v41 = vld [vmem:[%s4368_s6 + $0x38] sm:$0xff] }
 0x267   :  { %1799 = vmatmul.f32.vlgmr.msrb.gmra.mxu0 %v4123_v16  ;;  %2572 = vmatmul.msk.f32.vlgmr.msra.gmra.mxu1 %vm1699_vm0, %v4069_v6 }
 0x268   :  { %1971 = vmatpush.msra.mxu0 %v1910_v40  ;;  %1827 = vmatpush.msra.mxu2 %v1672_v37  ;;  %v1904_v40 = vld [vmem:[%s4368_s6 + $0x148] sm:$0xff]  ;;  %v1883_v37 = vld [vmem:[%s4368_s6 + $0xa0] sm:$0xff] }
 0x269   :  { %1931 = vmatpush.msra.mxu1 %v1878_v18  ;;  %1954 = vmatpush.msrb.mxu3 %v1891_v58  ;;  %v1903_v18 = vld [vmem:[%s4368_s6 + $0x140] sm:$0xff]  ;;  %v1881_v58 = vld [vmem:[%s4368_s6 + $0x90] sm:$0xff] }
 0x26a   :  { %1828 = vmatpush.msra.mxu2 %v1668_v50  ;;  %1972 = vmatpush.msra.mxu0 %v1909_v55  ;;  %v1868_v55 = vld [vmem:[%s4368_s6 + $0x28] sm:$0xff] }
 0x26b   :  { %1932 = vmatpush.msra.mxu1 %v1877_v15  ;;  %1955 = vmatpush.msrb.mxu3 %v1890_v48  ;;  %v1916_v50 = vld [vmem:[%s4368_s6 + $0x1a8] sm:$0xff]  ;;  %v1867_v15 = vld [vmem:[%s4368_s6 + $0x20] sm:$0xff]  ;;  %v1914_v48 = vld [vmem:[%s4368_s6 + $0x198] sm:$0xff] }
 0x26c   :  { %1829 = vmatpush.msra.mxu2 %v1664_v21  ;;  %1973 = vmatpush.msra.mxu0 %v1908_v11  ;;  %v1901_v11 = vld [vmem:[%s4368_s6 + $0x130] sm:$0xff]  ;;  %v1880_v21 = vld [vmem:[%s4368_s6 + $0x88] sm:$0xff] }
 0x26d   :  { %1933 = vmatpush.msra.mxu1 %v1876_v57  ;;  %1956 = vmatpush.msrb.mxu3 %v1889_v46  ;;  %v1900_v57 = vld [vmem:[%s4368_s6 + $0x128] sm:$0xff]  ;;  %v1898_v46 = vld [vmem:[%s4368_s6 + $0x118] sm:$0xff] }
 0x26e   :  { %1830 = vmatpush.msra.mxu2 %v1660_v42  ;;  %1974 = vmatpush.msra.mxu0 %v1907_v13  ;;  %v1865_v13 = vld [vmem:[%s4368_s6 + $0x10] sm:$0xff] }
 0x26f   :  { %1934 = vmatpush.msra.mxu1 %v1875_v20  ;;  %1957 = vmatpush.msrb.mxu3 %v1888_v14  ;;  %v1913_v42 = vld [vmem:[%s4368_s6 + $0x190] sm:$0xff]  ;;  %v1864_v20 = vld [vmem:[%s4368_s6 + $0x8] sm:$0xff] }
 0x270   :  { %1831 = vmatpush.msra.mxu2 %v1656_v12  ;;  %2574 = vmatmul.msk.f32.vlgmr.msrb.gmra.mxu1 %vm1699_vm0, %v4069_v6  ;;  %v1872_v6 = vld [vmem:[%s4368_s6 + $0x48] sm:$0xff] }
 0x271   :  { %1935 = vmatpush.msra.mxu1 %v1874_v62  ;;  %1975 = vmatpush.msra.mxu0 %v1906_v25  ;;  %v1896_v12 = vld [vmem:[%s4368_s6 + $0x108] sm:$0xff]  ;;  %v1895_v62 = vld [vmem:[%s4368_s6 + $0x100] sm:$0xff] }
 0x272   :  { %1832 = vmatpush.msra.mxu2 %v1652_v35  ;;  %1958 = vmatpush.msrb.mxu3 %v1887_v10  ;;  %v1912_v25 = vld [vmem:[%s4368_s6 + $0x188] sm:$0xff] }
 0x273   :  { %1936 = vmatpush.msra.mxu1 %v1873_v39  ;;  %1976 = vmatpush.msra.mxu0 %v1905_v30 }
 0x274   :  { %1833 = vmatpush.msra.mxu2 %v1648_v45  ;;  %1959 = vmatpush.msrb.mxu3 %v1886_v22 }
 0x275   :  { %1937 = vmatpush.msra.mxu1 %v1872_v6  ;;  %1977 = vmatpush.msra.mxu0 %v1904_v40 }
 0x276   :  { %1834 = vmatpush.msra.mxu2 %v1644_v53  ;;  %1960 = vmatpush.msrb.mxu3 %v1885_v29 }
 0x277   :  { %1938 = vmatpush.msra.mxu1 %v1871_v33  ;;  %1978 = vmatpush.msra.mxu0 %v1903_v18 }
 0x278   :  { %1835 = vmatpush.msra.mxu2 %v1640_v3  ;;  %1961 = vmatpush.msrb.mxu3 %v1884_v59 }
 0x279   :  { %1939 = vmatpush.msra.mxu1 %v1870_v41  ;;  %1979 = vmatpush.msra.mxu0 %v1902_v4 }
 0x27a   :  { %1836 = vmatpush.msra.mxu2 %v1636_v52  ;;  %1962 = vmatpush.msrb.mxu3 %v1883_v37 }
 0x27b   :  { %1940 = vmatpush.msra.mxu1 %v1869_v23  ;;  %1980 = vmatpush.msra.mxu0 %v1901_v11 }
 0x27c   :  { %1837 = vmatpush.msra.mxu2 %v1632_v54  ;;  %1963 = vmatpush.msrb.mxu3 %v1882_v5 }
 0x27d   :  { %1941 = vmatpush.msra.mxu1 %v1868_v55  ;;  %1981 = vmatpush.msra.mxu0 %v1900_v57 }
 0x27e   :  { %1838 = vmatpush.msra.mxu2 %v1628_v2  ;;  %1964 = vmatpush.msrb.mxu3 %v1881_v58 }
 0x27f   :  { %1839 = vmatmul.f32.vlgmr.msra.gmra.mxu2 %v4123_v16  ;;  %v1921_v16 = vld [vmem:[%s4368_s6 + $0x1d0] sm:$0xff]  ;;  %1942 = vmatpush.msra.mxu1 %v1867_v15 }
 0x280   :  { %1991 = vmatpush.msrb.mxu2 %v1926_v0  ;;  %1965 = vmatpush.msrb.mxu3 %v1880_v21 }
 0x281   :  { %1943 = vmatpush.msra.mxu1 %v1866_v49  ;;  %1982 = vmatpush.msra.mxu0 %v1899_v61 }
 0x282   :  { %1992 = vmatpush.msrb.mxu2 %v1925_v27  ;;  %1966 = vmatpush.msrb.mxu3 %v1879_v63 }
 0x283   :  { %1944 = vmatpush.msra.mxu1 %v1865_v13  ;;  %1983 = vmatpush.msra.mxu0 %v1898_v46 }
 0x284   :  { %1993 = vmatpush.msrb.mxu2 %v1924_v34 }
 0x285   :  { %1945 = vmatpush.msra.mxu1 %v1864_v20  ;;  %1984 = vmatpush.msra.mxu0 %v1897_v44 }
 0x286   :  { %1994 = vmatpush.msrb.mxu2 %v1923_v43 }
 0x287   :  { %1946 = vmatpush.msra.mxu1 %v1863_v47  ;;  %1985 = vmatpush.msra.mxu0 %v1896_v12 }
 0x288   :  { %1995 = vmatpush.msrb.mxu2 %v1922_v38 }
 0x289   :  { %1986 = vmatpush.msra.mxu0 %v1895_v62 }
 0x28a   :  { %1996 = vmatpush.msrb.mxu2 %v1921_v16 }
 0x28c   :  { %1997 = vmatpush.msrb.mxu2 %v1920_v28 }
 0x28e   :  { %1998 = vmatpush.msrb.mxu2 %v1919_v56 }
 0x290   :  { %1999 = vmatpush.msrb.mxu2 %v1918_v1 }
 0x292   :  { %2000 = vmatpush.msrb.mxu2 %v1917_v36 }
 0x294   :  { %2001 = vmatpush.msrb.mxu2 %v1916_v50 }
 0x296   :  { %2002 = vmatpush.msrb.mxu2 %v1915_v60 }
 0x298   :  { %2003 = vmatpush.msrb.mxu2 %v1914_v48 }
 0x29a   :  { %2004 = vmatpush.msrb.mxu2 %v1913_v42 }
 0x29c   :  { %2005 = vmatpush.msrb.mxu2 %v1912_v25 }
 0x29e   :  { %2006 = vmatpush.msrb.mxu2 %v1911_v8 }
 0x2d7   :  { %v1780_v17 = vpop.f32.mrf.mxu3 }
 0x2dc   :  { %v1720_v14 = vpop.f32.mrf.mxu1 }
 0x2e0   :  { %v1860_v6 = vpop.f32.mrf.mxu3 }
 0x2e4   :  { %v1740_v35 = vpop.f32.mrf.mxu1  ;;  %v1760_v39 = vpop.f32.mrf.mxu2 }
 0x2e5   :  { %v1741_v10 = vadd.f32 %v1740_v35, %v1720_v14  ;;  %v1781_v30 = vadd.f32 %v1780_v17, %v1760_v39  ;;  %v1800_v24 = vpop.f32.mrf.mxu0 }
 0x2e7   :  { %1947 = vmatmul.f32.vlgmr.msra.gmra.mxu1 %v1741_v10  ;;  %1967 = vmatmul.f32.vlgmr.msrb.gmra.mxu3 %v1781_v30 }
 0x2ed   :  { %v1820_v7 = vpop.f32.mrf.mxu1 }
 0x2ee   :  { %v1821_v45 = vadd.f32 %v1820_v7, %v1800_v24 }
 0x2f0   :  { %1987 = vmatmul.f32.vlgmr.msra.gmra.mxu0 %v1821_v45 }
 0x302   :  { %v1840_v22 = vpop.f32.mrf.mxu2 }
 0x303   :  { %v1861_v26 = vadd.f32 %v1860_v6, %v1840_v22 }
 0x305   :  { %2007 = vmatmul.f32.vlgmr.msrb.gmra.mxu2 %v1861_v26 }
 0x364   :  { %v1948_v53 = vpop.f32.mrf.mxu1 }
 0x365   :  { %v1949_v33 = vadd.f32 %v2699_v32, %v1948_v53 }
 0x36a   :  { %v1968_v29 = vpop.f32.mrf.mxu3 }
 0x36b   :  { %v1969_v19 = vadd.f32 %v1968_v29, %v1949_v33 }
 0x36d   :  { %v1988_v51 = vpop.f32.mrf.mxu0 }
 0x36e   :  { %v1989_v3 = vadd.f32 %v1988_v51, %v1969_v19 }
 0x388   :  { %v2008_v9 = vpop.f32.mrf.mxu2 }
 0x389   :  { %v2009_v31 = vadd.f32 %v2008_v9, %v1989_v3 }
 0x38b   :  { %2011 = vst [vmem:[%s4370_s8] sm:$0xff] %v2009_v31 }

</bundles_post_ra>
